<compile_context>
chip_gen: v7x
topology: tpu7x:2x2x1
jax: 0.10.0
libtpu: 0.0.40
codegen_flags: <defaults>
</compile_context>

<pallas_src>
import numpy as np
import jax
import jax.numpy as jnp
from jax import lax
from jax.experimental import pallas as pl
from jax.experimental.pallas import tpu as pltpu


def _round_up(x: int, m: int) -> int:
    return (x + m - 1) // m * m


def _gaussian_kernel1d_np(window_size: int, sigma: float) -> np.ndarray:
    """Same construction as kornia get_gaussian_kernel1d(K, sigma)."""
    x = np.arange(window_size, dtype=np.float64) - window_size // 2
    if window_size % 2 == 0:
        x = x + 0.5
    g = np.exp(-(x ** 2) / (2.0 * sigma ** 2))
    g = g / g.sum()
    return g.astype(np.float32)


def _vmem_capacity_bytes() -> int:
    """Physical VMEM of the local TPU; 64 MiB (v7x-safe) fallback."""
    try:
        return int(pltpu.get_tpu_info().vmem_capacity_bytes)
    except Exception:  # noqa: BLE001 - be robust to API/backend differences
        return 64 * 1024 * 1024


def _pick_tile_h(H, W, K, in_itemsize, use_mxu_h, vmem_budget):
    """Largest H-strip (multiple of the halo block) that fits the VMEM budget."""
    halo = _round_up(K - 1, 8)            # halo block height (>= K-1, 8-aligned)
    Wp = W + K - 1
    max_th = max(halo, min((128 // halo) * halo, _round_up(H, halo)))
    best = halo
    t = halo
    while t <= max_th:
        est = (2 * 2 * (t + halo) * Wp * in_itemsize        # double-buffered inputs
               + 2 * (t * t + t * halo) * 4                  # gva / gvb weights
               + (2 * Wp * W * 4 if use_mxu_h else 0)        # gh weights
               + (4 * t * Wp + 10 * t * W) * 4               # live f32 temporaries
               + 2 * 8 * 128 * 4)                            # output tile
        if est <= vmem_budget:
            best = t
        t += halo
    return best, halo


def _make_kernel(*, H, W, K, tH, C1, C2, eps, use_mxu_h, gw):
    f32 = jnp.float32
    need_row_mask = (H % tH) != 0
    hi = jax.lax.Precision.HIGHEST

    def kernel(x1c_ref, x1h_ref, x2c_ref, x2h_ref, gva_ref, gvb_ref, *rest):
        if use_mxu_h:
            gh_ref, out_ref = rest
        else:
            (out_ref,) = rest

        # Native-dtype blocks, cast to f32 in-kernel (halves HBM traffic for
        # bf16/uint8 inputs; no-op for f32).
        x1c = x1c_ref[...].astype(f32)        # (tH,   Wp)  current strip
        x2c = x2c_ref[...].astype(f32)
        x1h = x1h_ref[...].astype(f32)        # (halo, Wp)  halo (next strip head)
        x2h = x2h_ref[...].astype(f32)
        gva = gva_ref[...]                    # (tH, tH)    banded vertical Gaussian
        gvb = gvb_ref[...]                    # (tH, halo)  halo part (zero cols > K-1)

        def vfilt(cur, halo_rows):
            # Vertical separable Gaussian as dense banded matmuls on the MXU.
            return (jnp.dot(gva, cur, preferred_element_type=f32, precision=hi)
                    + jnp.dot(gvb, halo_rows, preferred_element_type=f32,
                              precision=hi))                 # (tH, Wp)

        if use_mxu_h:
            gh = gh_ref[...]                  # (Wp, W) banded horizontal Gaussian

            def hfilt(fv):
                return jnp.dot(fv, gh, preferred_element_type=f32, precision=hi)
        else:
            # VPU fallback for very wide images (gh matrix would be too big).
            def hfilt(fv):
                acc = gw[0] * fv[:, 0:W]
                for dx in range(1, K):
                    acc = acc + gw[dx] * fv[:, dx:dx + W]
                return acc

        def sep(cur, halo_rows):
            return hfilt(vfilt(cur, halo_rows))               # (tH, W)

        # Squares / products computed exactly once per element (hoisted).
        mu1 = sep(x1c, x1h)
        mu2 = sep(x2c, x2h)
        s12 = sep(x1c * x2c, x1h * x2h)
        s11 = sep(x1c * x1c, x1h * x1h)
        s22 = sep(x2c * x2c, x2h * x2h)

        mu1_mu2 = mu1 * mu2
        mu1_sq = mu1 * mu1
        mu2_sq = mu2 * mu2
        num = (2.0 * mu1_mu2 + C1) * (2.0 * (s12 - mu1_mu2) + C2)
        den = (mu1_sq + mu2_sq + C1) * ((s11 - mu1_sq) + (s22 - mu2_sq) + C2)
        den = jnp.maximum(den, f32(eps))      # torch.clamp(den, min=eps)

        # Approx reciprocal (EUP slot) + one Newton step -> fp32-accurate.
        r = pl.reciprocal(den, approx=True)
        r = r * (2.0 - den * r)
        ssim_map = jnp.clip((1.0 - num * r) * 0.5, 0.0, 1.0)
        # ssim_loss(): (1 - ssim_map)/2 is already in [0, 0.5]; the spec's
        # second clamp is a mathematical no-op.
        loss_map = (1.0 - ssim_map) * 0.5

        if need_row_mask:                     # ragged last H-strip
            i = pl.program_id(1)
            rows = lax.broadcasted_iota(jnp.int32, loss_map.shape, 0)
            loss_map = jnp.where(rows < (H - i * tH), loss_map, 0.0)

        # Per-(plane, strip) partial sum; final mean is a tiny plain-JAX reduce.
        out_ref[...] = jnp.broadcast_to(jnp.sum(loss_map), out_ref.shape)

    return kernel


def ssim_loss_pallas(img1, img2, window_size: int = 5, max_val: float = 1.0,
                     eps: float = 1e-12):
    """Pallas implementation of SSIMLoss(window_size).forward, reduction='mean'."""
    assert img1.shape == img2.shape and img1.ndim == 4
    assert window_size % 2 == 1, "only odd window sizes supported"
    B, C, H, W = img1.shape
    K = window_size
    pad = K // 2
    BC = B * C
    Hp, Wp = H + 2 * pad, W + 2 * pad

    g = _gaussian_kernel1d_np(K, 1.5)
    C1 = (0.01 * max_val) ** 2
    C2 = (0.03 * max_val) ** 2

    in_itemsize = jnp.dtype(img1.dtype).itemsize
    use_mxu_h = (Wp * W * 4) <= (4 * 1024 * 1024)

    # Generation-aware sizing (v7x: 64 MiB VMEM; v5e/v6e: 128 MiB).
    vmem_cap = _vmem_capacity_bytes()
    vmem_budget = int(0.45 * vmem_cap)
    vmem_limit = min(int(0.8 * vmem_cap), 100 * 1024 * 1024)
    tH, halo = _pick_tile_h(H, W, K, in_itemsize, use_mxu_h, vmem_budget)
    n_strips = (H + tH - 1) // tH
    Hp_arr = n_strips * tH + halo            # so every halo block stays in-bounds

    # Reflect pad (== F.pad(..., mode='reflect')), reshape to planes — W stays
    # in the lane dim, no transpose — then zero-pad the bottom rows so the last
    # strip's halo block is in-bounds (zero rows only ever meet zero weights).
    # TODO(synk): fold the reflect padding into the kernel.
    pads = ((0, 0), (0, 0), (pad, pad), (pad, pad))
    p1 = jnp.pad(img1, pads, mode="reflect").reshape(BC, Hp, Wp)
    p2 = jnp.pad(img2, pads, mode="reflect").reshape(BC, Hp, Wp)
    if Hp_arr > Hp:
        bp = ((0, 0), (0, Hp_arr - Hp), (0, 0))
        p1 = jnp.pad(p1, bp)
        p2 = jnp.pad(p2, bp)

    # Banded separable-Gaussian matrices (compile-time constants).
    gv_full = np.zeros((tH, tH + halo), np.float32)
    for r in range(tH):
        gv_full[r, r:r + K] = g
    gva = jnp.asarray(gv_full[:, :tH])        # acts on the current strip
    gvb = jnp.asarray(gv_full[:, tH:])        # acts on the halo rows
    gh = None
    if use_mxu_h:
        gh_np = np.zeros((Wp, W), np.float32)
        for w in range(W):
            gh_np[w:w + K, w] = g
        gh = jnp.asarray(gh_np)

    kernel = _make_kernel(H=H, W=W, K=K, tH=tH, C1=float(C1), C2=float(C2),
                          eps=float(eps), use_mxu_h=use_mxu_h,
                          gw=tuple(float(v) for v in g))

    cur_spec = pl.BlockSpec((None, tH, Wp), lambda b, i: (b, i, 0))
    halo_spec = pl.BlockSpec((None, halo, Wp),
                             lambda b, i: (b, (i + 1) * (tH // halo), 0))

    in_specs = [cur_spec, halo_spec, cur_spec, halo_spec,
                pl.BlockSpec((tH, tH), lambda b, i: (0, 0)),
                pl.BlockSpec((tH, halo), lambda b, i: (0, 0))]
    args = [p1, p1, p2, p2, gva, gvb]
    if use_mxu_h:
        in_specs.append(pl.BlockSpec((Wp, W), lambda b, i: (0, 0)))
        args.append(gh)

    per_strip = pl.pallas_call(
        kernel,
        out_shape=jax.ShapeDtypeStruct((BC, n_strips, 8, 128), jnp.float32),
        grid=(BC, n_strips),
        in_specs=in_specs,
        out_specs=pl.BlockSpec((None, None, 8, 128), lambda b, i: (b, i, 0, 0)),
        compiler_params=pltpu.CompilerParams(
            dimension_semantics=("parallel", "parallel"),
            vmem_limit_bytes=vmem_limit),
    )(*args)

    plane_strip_sums = per_strip[:, :, 0, 0]                  # (BC, n_strips)
    return jnp.sum(plane_strip_sums) / jnp.float32(B * C * H * W)


def _gaussian_kernel2d(window_size: int, sigma: float) -> jnp.ndarray:
    g = jnp.asarray(_gaussian_kernel1d_np(window_size, sigma))
    return jnp.outer(g, g)


def ssim_loss_ref(img1, img2, window_size: int = 5, max_val: float = 1.0,
                  eps: float = 1e-12):
    """Pure-JAX reference mirroring the PyTorch spec (for validation)."""
    B, C, H, W = img1.shape
    K = window_size
    pad = K // 2
    w2d = _gaussian_kernel2d(K, 1.5)
    C1 = (0.01 * max_val) ** 2
    C2 = (0.03 * max_val) ** 2
    pads = ((0, 0), (0, 0), (pad, pad), (pad, pad))
    p1 = jnp.pad(img1.astype(jnp.float32), pads, mode="reflect")
    p2 = jnp.pad(img2.astype(jnp.float32), pads, mode="reflect")

    def filt(x):
        out = jnp.zeros((B, C, H, W), jnp.float32)
        for dy in range(K):
            for dx in range(K):
                out = out + w2d[dy, dx] * x[:, :, dy:dy + H, dx:dx + W]
        return out

    mu1, mu2 = filt(p1), filt(p2)
    s11, s22, s12 = filt(p1 * p1), filt(p2 * p2), filt(p1 * p2)
    mu1_sq, mu2_sq, mu1_mu2 = mu1 * mu1, mu2 * mu2, mu1 * mu2
    sigma1_sq, sigma2_sq, sigma12 = s11 - mu1_sq, s22 - mu2_sq, s12 - mu1_mu2
    num = (2.0 * mu1_mu2 + C1) * (2.0 * sigma12 + C2)
    den = (mu1_sq + mu2_sq + C1) * (sigma1_sq + sigma2_sq + C2)
    den = jnp.maximum(den, eps)
    ssim_map = jnp.clip((1.0 - num / den) / 2.0, 0.0, 1.0)
    loss_map = jnp.clip((1.0 - ssim_map) / 2.0, 0.0, 1.0)
    return jnp.mean(loss_map)


if __name__ == "__main__":
    key = jax.random.PRNGKey(0)
    k1, k2 = jax.random.split(key)
    B, C, H, W = 2, 4, 16, 16
    img1 = jax.random.uniform(k1, (B, C, H, W), dtype=jnp.float32)
    img2 = jax.random.uniform(k2, (B, C, H, W), dtype=jnp.float32)

    loss = ssim_loss_pallas(img1, img2, window_size=5)
    loss = jax.block_until_ready(loss)

    ref = ssim_loss_ref(img1, img2, window_size=5)
    # Newton-refined reciprocal + f32 (HIGHEST) matmuls -> fp32-level tolerance.
    assert jnp.allclose(loss, ref, atol=3e-5, rtol=3e-5), (loss, ref)

    print("KERNEL_OK")
</pallas_src>

<mosaic_0001>
module attributes {stable_mosaic.version = 11 : i64} {
  func.func @kernel(%arg0: i32, %arg1: i32, %arg2: memref<1x16x20xf32, #tpu.memory_space<vmem>>, %arg3: memref<1x8x20xf32, #tpu.memory_space<vmem>>, %arg4: memref<1x16x20xf32, #tpu.memory_space<vmem>>, %arg5: memref<1x8x20xf32, #tpu.memory_space<vmem>>, %arg6: memref<16x16xf32, #tpu.memory_space<vmem>>, %arg7: memref<16x8xf32, #tpu.memory_space<vmem>>, %arg8: memref<20x16xf32, #tpu.memory_space<vmem>>, %arg9: memref<1x1x8x128xf32, #tpu.memory_space<vmem>>) attributes {dimension_semantics = [#tpu.dimension_semantics<parallel>, #tpu.dimension_semantics<parallel>], iteration_bounds = array<i64: 8, 1>, scalar_prefetch = 0 : i64, scratch_operands = 0 : i64, tpu.core_type = #tpu.core_type<tc>, window_params = [{transform_indices = @transform_0, window_bounds = array<i64: 1, 16, 20>}, {transform_indices = @transform_1, window_bounds = array<i64: 1, 8, 20>}, {transform_indices = @transform_2, window_bounds = array<i64: 1, 16, 20>}, {transform_indices = @transform_3, window_bounds = array<i64: 1, 8, 20>}, {pipeline_mode = #tpu.pipeline_mode<synchronous>, transform_indices = @transform_4, window_bounds = array<i64: 16, 16>}, {pipeline_mode = #tpu.pipeline_mode<synchronous>, transform_indices = @transform_5, window_bounds = array<i64: 16, 8>}, {pipeline_mode = #tpu.pipeline_mode<synchronous>, transform_indices = @transform_6, window_bounds = array<i64: 20, 16>}, {transform_indices = @transform_7, window_bounds = array<i64: 1, 1, 8, 128>}]} {
    %c0 = arith.constant 0 : index
    %c0_0 = arith.constant 0 : index
    %c0_1 = arith.constant 0 : index
    %0 = vector.load %arg2[%c0, %c0_0, %c0_1] : memref<1x16x20xf32, #tpu.memory_space<vmem>>, vector<1x16x20xf32>
    %1 = vector.shape_cast %0 : vector<1x16x20xf32> to vector<16x20xf32>
    %c0_2 = arith.constant 0 : index
    %c0_3 = arith.constant 0 : index
    %c0_4 = arith.constant 0 : index
    %2 = vector.load %arg4[%c0_2, %c0_3, %c0_4] : memref<1x16x20xf32, #tpu.memory_space<vmem>>, vector<1x16x20xf32>
    %3 = vector.shape_cast %2 : vector<1x16x20xf32> to vector<16x20xf32>
    %c0_5 = arith.constant 0 : index
    %c0_6 = arith.constant 0 : index
    %c0_7 = arith.constant 0 : index
    %4 = vector.load %arg3[%c0_5, %c0_6, %c0_7] : memref<1x8x20xf32, #tpu.memory_space<vmem>>, vector<1x8x20xf32>
    %5 = vector.shape_cast %4 : vector<1x8x20xf32> to vector<8x20xf32>
    %c0_8 = arith.constant 0 : index
    %c0_9 = arith.constant 0 : index
    %c0_10 = arith.constant 0 : index
    %6 = vector.load %arg5[%c0_8, %c0_9, %c0_10] : memref<1x8x20xf32, #tpu.memory_space<vmem>>, vector<1x8x20xf32>
    %7 = vector.shape_cast %6 : vector<1x8x20xf32> to vector<8x20xf32>
    %c0_11 = arith.constant 0 : index
    %c0_12 = arith.constant 0 : index
    %8 = vector.load %arg6[%c0_11, %c0_12] : memref<16x16xf32, #tpu.memory_space<vmem>>, vector<16x16xf32>
    %c0_13 = arith.constant 0 : index
    %c0_14 = arith.constant 0 : index
    %9 = vector.load %arg7[%c0_13, %c0_14] : memref<16x8xf32, #tpu.memory_space<vmem>>, vector<16x8xf32>
    %c0_15 = arith.constant 0 : index
    %c0_16 = arith.constant 0 : index
    %10 = vector.load %arg8[%c0_15, %c0_16] : memref<20x16xf32, #tpu.memory_space<vmem>>, vector<20x16xf32>
    %cst = arith.constant dense<0.000000e+00> : vector<16x20xf32>
    %11 = tpu.matmul %8, %1, %cst {dimension_numbers = #tpu.dot_dimension_numbers<[1], [0], [0], [1], [0, 0, 1, 1], [], []>, precision = #tpu.contract_precision<fp32>} : vector<16x16xf32>, vector<16x20xf32>, vector<16x20xf32> -> vector<16x20xf32>
    %cst_17 = arith.constant dense<0.000000e+00> : vector<16x20xf32>
    %12 = tpu.matmul %9, %5, %cst_17 {dimension_numbers = #tpu.dot_dimension_numbers<[1], [0], [0], [1], [0, 0, 1, 1], [], []>, precision = #tpu.contract_precision<fp32>} : vector<16x8xf32>, vector<8x20xf32>, vector<16x20xf32> -> vector<16x20xf32>
    %13 = arith.addf %11, %12 : vector<16x20xf32>
    %cst_18 = arith.constant dense<0.000000e+00> : vector<16x16xf32>
    %14 = tpu.matmul %13, %10, %cst_18 {dimension_numbers = #tpu.dot_dimension_numbers<[1], [0], [0], [1], [0, 0, 1, 1], [], []>, precision = #tpu.contract_precision<fp32>} : vector<16x20xf32>, vector<20x16xf32>, vector<16x16xf32> -> vector<16x16xf32>
    %cst_19 = arith.constant dense<0.000000e+00> : vector<16x20xf32>
    %15 = tpu.matmul %8, %3, %cst_19 {dimension_numbers = #tpu.dot_dimension_numbers<[1], [0], [0], [1], [0, 0, 1, 1], [], []>, precision = #tpu.contract_precision<fp32>} : vector<16x16xf32>, vector<16x20xf32>, vector<16x20xf32> -> vector<16x20xf32>
    %cst_20 = arith.constant dense<0.000000e+00> : vector<16x20xf32>
    %16 = tpu.matmul %9, %7, %cst_20 {dimension_numbers = #tpu.dot_dimension_numbers<[1], [0], [0], [1], [0, 0, 1, 1], [], []>, precision = #tpu.contract_precision<fp32>} : vector<16x8xf32>, vector<8x20xf32>, vector<16x20xf32> -> vector<16x20xf32>
    %17 = arith.addf %15, %16 : vector<16x20xf32>
    %cst_21 = arith.constant dense<0.000000e+00> : vector<16x16xf32>
    %18 = tpu.matmul %17, %10, %cst_21 {dimension_numbers = #tpu.dot_dimension_numbers<[1], [0], [0], [1], [0, 0, 1, 1], [], []>, precision = #tpu.contract_precision<fp32>} : vector<16x20xf32>, vector<20x16xf32>, vector<16x16xf32> -> vector<16x16xf32>
    %19 = arith.mulf %1, %3 : vector<16x20xf32>
    %20 = arith.mulf %5, %7 : vector<8x20xf32>
    %cst_22 = arith.constant dense<0.000000e+00> : vector<16x20xf32>
    %21 = tpu.matmul %8, %19, %cst_22 {dimension_numbers = #tpu.dot_dimension_numbers<[1], [0], [0], [1], [0, 0, 1, 1], [], []>, precision = #tpu.contract_precision<fp32>} : vector<16x16xf32>, vector<16x20xf32>, vector<16x20xf32> -> vector<16x20xf32>
    %cst_23 = arith.constant dense<0.000000e+00> : vector<16x20xf32>
    %22 = tpu.matmul %9, %20, %cst_23 {dimension_numbers = #tpu.dot_dimension_numbers<[1], [0], [0], [1], [0, 0, 1, 1], [], []>, precision = #tpu.contract_precision<fp32>} : vector<16x8xf32>, vector<8x20xf32>, vector<16x20xf32> -> vector<16x20xf32>
    %23 = arith.addf %21, %22 : vector<16x20xf32>
    %cst_24 = arith.constant dense<0.000000e+00> : vector<16x16xf32>
    %24 = tpu.matmul %23, %10, %cst_24 {dimension_numbers = #tpu.dot_dimension_numbers<[1], [0], [0], [1], [0, 0, 1, 1], [], []>, precision = #tpu.contract_precision<fp32>} : vector<16x20xf32>, vector<20x16xf32>, vector<16x16xf32> -> vector<16x16xf32>
    %25 = arith.mulf %1, %1 : vector<16x20xf32>
    %26 = arith.mulf %5, %5 : vector<8x20xf32>
    %cst_25 = arith.constant dense<0.000000e+00> : vector<16x20xf32>
    %27 = tpu.matmul %8, %25, %cst_25 {dimension_numbers = #tpu.dot_dimension_numbers<[1], [0], [0], [1], [0, 0, 1, 1], [], []>, precision = #tpu.contract_precision<fp32>} : vector<16x16xf32>, vector<16x20xf32>, vector<16x20xf32> -> vector<16x20xf32>
    %cst_26 = arith.constant dense<0.000000e+00> : vector<16x20xf32>
    %28 = tpu.matmul %9, %26, %cst_26 {dimension_numbers = #tpu.dot_dimension_numbers<[1], [0], [0], [1], [0, 0, 1, 1], [], []>, precision = #tpu.contract_precision<fp32>} : vector<16x8xf32>, vector<8x20xf32>, vector<16x20xf32> -> vector<16x20xf32>
    %29 = arith.addf %27, %28 : vector<16x20xf32>
    %cst_27 = arith.constant dense<0.000000e+00> : vector<16x16xf32>
    %30 = tpu.matmul %29, %10, %cst_27 {dimension_numbers = #tpu.dot_dimension_numbers<[1], [0], [0], [1], [0, 0, 1, 1], [], []>, precision = #tpu.contract_precision<fp32>} : vector<16x20xf32>, vector<20x16xf32>, vector<16x16xf32> -> vector<16x16xf32>
    %31 = arith.mulf %3, %3 : vector<16x20xf32>
    %32 = arith.mulf %7, %7 : vector<8x20xf32>
    %cst_28 = arith.constant dense<0.000000e+00> : vector<16x20xf32>
    %33 = tpu.matmul %8, %31, %cst_28 {dimension_numbers = #tpu.dot_dimension_numbers<[1], [0], [0], [1], [0, 0, 1, 1], [], []>, precision = #tpu.contract_precision<fp32>} : vector<16x16xf32>, vector<16x20xf32>, vector<16x20xf32> -> vector<16x20xf32>
    %cst_29 = arith.constant dense<0.000000e+00> : vector<16x20xf32>
    %34 = tpu.matmul %9, %32, %cst_29 {dimension_numbers = #tpu.dot_dimension_numbers<[1], [0], [0], [1], [0, 0, 1, 1], [], []>, precision = #tpu.contract_precision<fp32>} : vector<16x8xf32>, vector<8x20xf32>, vector<16x20xf32> -> vector<16x20xf32>
    %35 = arith.addf %33, %34 : vector<16x20xf32>
    %cst_30 = arith.constant dense<0.000000e+00> : vector<16x16xf32>
    %36 = tpu.matmul %35, %10, %cst_30 {dimension_numbers = #tpu.dot_dimension_numbers<[1], [0], [0], [1], [0, 0, 1, 1], [], []>, precision = #tpu.contract_precision<fp32>} : vector<16x20xf32>, vector<20x16xf32>, vector<16x16xf32> -> vector<16x16xf32>
    %37 = arith.mulf %14, %18 : vector<16x16xf32>
    %38 = arith.mulf %14, %14 : vector<16x16xf32>
    %39 = arith.mulf %18, %18 : vector<16x16xf32>
    %cst_31 = arith.constant 2.000000e+00 : f32
    %40 = vector.broadcast %cst_31 : f32 to vector<16x16xf32>
    %41 = arith.mulf %40, %37 : vector<16x16xf32>
    %cst_32 = arith.constant 9.99999974E-5 : f32
    %42 = vector.broadcast %cst_32 : f32 to vector<16x16xf32>
    %43 = arith.addf %41, %42 : vector<16x16xf32>
    %44 = arith.subf %24, %37 : vector<16x16xf32>
    %cst_33 = arith.constant 2.000000e+00 : f32
    %45 = vector.broadcast %cst_33 : f32 to vector<16x16xf32>
    %46 = arith.mulf %45, %44 : vector<16x16xf32>
    %cst_34 = arith.constant 8.99999984E-4 : f32
    %47 = vector.broadcast %cst_34 : f32 to vector<16x16xf32>
    %48 = arith.addf %46, %47 : vector<16x16xf32>
    %49 = arith.mulf %43, %48 : vector<16x16xf32>
    %50 = arith.addf %38, %39 : vector<16x16xf32>
    %cst_35 = arith.constant 9.99999974E-5 : f32
    %51 = vector.broadcast %cst_35 : f32 to vector<16x16xf32>
    %52 = arith.addf %50, %51 : vector<16x16xf32>
    %53 = arith.subf %30, %38 : vector<16x16xf32>
    %54 = arith.subf %36, %39 : vector<16x16xf32>
    %55 = arith.addf %53, %54 : vector<16x16xf32>
    %cst_36 = arith.constant 8.99999984E-4 : f32
    %56 = vector.broadcast %cst_36 : f32 to vector<16x16xf32>
    %57 = arith.addf %55, %56 : vector<16x16xf32>
    %58 = arith.mulf %52, %57 : vector<16x16xf32>
    %cst_37 = arith.constant 9.99999996E-13 : f32
    %59 = vector.broadcast %cst_37 : f32 to vector<16x16xf32>
    %60 = arith.maximumf %58, %59 : vector<16x16xf32>
    %61 = tpu.reciprocal %60 {approx = true} : vector<16x16xf32> -> vector<16x16xf32>
    %62 = arith.mulf %60, %61 : vector<16x16xf32>
    %cst_38 = arith.constant 2.000000e+00 : f32
    %63 = vector.broadcast %cst_38 : f32 to vector<16x16xf32>
    %64 = arith.subf %63, %62 : vector<16x16xf32>
    %65 = arith.mulf %61, %64 : vector<16x16xf32>
    %66 = arith.mulf %49, %65 : vector<16x16xf32>
    %cst_39 = arith.constant 1.000000e+00 : f32
    %67 = vector.broadcast %cst_39 : f32 to vector<16x16xf32>
    %68 = arith.subf %67, %66 : vector<16x16xf32>
    %cst_40 = arith.constant 5.000000e-01 : f32
    %69 = vector.broadcast %cst_40 : f32 to vector<16x16xf32>
    %70 = arith.mulf %68, %69 : vector<16x16xf32>
    %cst_41 = arith.constant 0.000000e+00 : f32
    %cst_42 = arith.constant 1.000000e+00 : f32
    %71 = vector.broadcast %cst_41 : f32 to vector<16x16xf32>
    %72 = arith.maximumf %71, %70 : vector<16x16xf32>
    %73 = vector.broadcast %cst_42 : f32 to vector<16x16xf32>
    %74 = arith.minimumf %73, %72 : vector<16x16xf32>
    %cst_43 = arith.constant 1.000000e+00 : f32
    %75 = vector.broadcast %cst_43 : f32 to vector<16x16xf32>
    %76 = arith.subf %75, %74 : vector<16x16xf32>
    %cst_44 = arith.constant 5.000000e-01 : f32
    %77 = vector.broadcast %cst_44 : f32 to vector<16x16xf32>
    %78 = arith.mulf %76, %77 : vector<16x16xf32>
    %79 = vector.shape_cast %78 : vector<16x16xf32> to vector<1x16x16xf32>
    %cst_45 = arith.constant dense<0.000000e+00> : vector<1xf32>
    %80 = vector.multi_reduction <add>, %79, %cst_45 [1, 2] : vector<1x16x16xf32> to vector<1xf32>
    %81 = vector.shape_cast %80 : vector<1xf32> to vector<1x1x1xf32>
    %82 = vector.extract %81[0, 0, 0] : f32 from vector<1x1x1xf32>
    %83 = vector.broadcast %82 : f32 to vector<8x128xf32>
    %c0_46 = arith.constant 0 : index
    %c0_47 = arith.constant 0 : index
    %c0_48 = arith.constant 0 : index
    %c0_49 = arith.constant 0 : index
    %84 = vector.load %arg9[%c0_46, %c0_47, %c0_48, %c0_49] : memref<1x1x8x128xf32, #tpu.memory_space<vmem>>, vector<1x1x8x128xf32>
    %85 = vector.shape_cast %84 : vector<1x1x8x128xf32> to vector<8x128xf32>
    %86 = vector.shape_cast %83 : vector<8x128xf32> to vector<1x1x8x128xf32>
    tpu.vector_store %arg9[%c0_46, %c0_47, %c0_48, %c0_49], %86 {strides = array<i32>} : memref<1x1x8x128xf32, #tpu.memory_space<vmem>>, vector<1x1x8x128xf32>,
    return
  }
  func.func @transform_0(%arg0: i32, %arg1: i32) -> (i32, i32, i32) {
    %c0_i32 = arith.constant 0 : i32
    %c0_i32_0 = arith.constant 0 : i32
    return %arg0, %arg1, %c0_i32 : i32, i32, i32
  }
  func.func @transform_1(%arg0: i32, %arg1: i32) -> (i32, i32, i32) {
    %c1_i32 = arith.constant 1 : i32
    %0 = arith.addi %arg1, %c1_i32 : i32
    %c2_i32 = arith.constant 2 : i32
    %1 = arith.muli %0, %c2_i32 : i32
    %c0_i32 = arith.constant 0 : i32
    %c0_i32_0 = arith.constant 0 : i32
    return %arg0, %1, %c0_i32 : i32, i32, i32
  }
  func.func @transform_2(%arg0: i32, %arg1: i32) -> (i32, i32, i32) {
    %c0_i32 = arith.constant 0 : i32
    %c0_i32_0 = arith.constant 0 : i32
    return %arg0, %arg1, %c0_i32 : i32, i32, i32
  }
  func.func @transform_3(%arg0: i32, %arg1: i32) -> (i32, i32, i32) {
    %c1_i32 = arith.constant 1 : i32
    %0 = arith.addi %arg1, %c1_i32 : i32
    %c2_i32 = arith.constant 2 : i32
    %1 = arith.muli %0, %c2_i32 : i32
    %c0_i32 = arith.constant 0 : i32
    %c0_i32_0 = arith.constant 0 : i32
    return %arg0, %1, %c0_i32 : i32, i32, i32
  }
  func.func @transform_4(%arg0: i32, %arg1: i32) -> (i32, i32) {
    %c0_i32 = arith.constant 0 : i32
    %c0_i32_0 = arith.constant 0 : i32
    %c0_i32_1 = arith.constant 0 : i32
    return %c0_i32, %c0_i32_0 : i32, i32
  }
  func.func @transform_5(%arg0: i32, %arg1: i32) -> (i32, i32) {
    %c0_i32 = arith.constant 0 : i32
    %c0_i32_0 = arith.constant 0 : i32
    %c0_i32_1 = arith.constant 0 : i32
    return %c0_i32, %c0_i32_0 : i32, i32
  }
  func.func @transform_6(%arg0: i32, %arg1: i32) -> (i32, i32) {
    %c0_i32 = arith.constant 0 : i32
    %c0_i32_0 = arith.constant 0 : i32
    %c0_i32_1 = arith.constant 0 : i32
    return %c0_i32, %c0_i32_0 : i32, i32
  }
  func.func @transform_7(%arg0: i32, %arg1: i32) -> (i32, i32, i32, i32) {
    %c0_i32 = arith.constant 0 : i32
    %c0_i32_0 = arith.constant 0 : i32
    %c0_i32_1 = arith.constant 0 : i32
    return %arg0, %arg1, %c0_i32, %c0_i32_0 : i32, i32, i32, i32
  }
}

</mosaic_0001>

<bundles_post_ra>
// kernel: tpu_custom_call.1
= control target key start
LH: loop header
LB: loop body
LE: loop exit
PB: predicated region body
PF: predicated region fallthrough
CT: control target
= control target key end

     0   :  { %12 = vsyncpa [#allocation3], 0  ;;  %s10441_s0 = inlined_call_operand.vmem [shape: f32[8,24,20], index: 0, kind: input, shape index: {}]   ;;  %s10442_s1 = inlined_call_operand.vmem [shape: f32[8,24,20], index: 1, kind: input, shape index: {}]   ;;  %s10443_s2 = inlined_call_operand.vmem [shape: f32[8,24,20], index: 2, kind: input, shape index: {}]   ;;  %s10444_s3 = inlined_call_operand.vmem [shape: f32[8,24,20], index: 3, kind: input, shape index: {}]   ;;  %s10445_s4 = inlined_call_operand.vmem [shape: f32[16,16], index: 4, kind: input, shape index: {}]   ;;  %s10446_s5 = inlined_call_operand.vmem [shape: f32[16,8], index: 5, kind: input, shape index: {}]   ;;  %s10447_s6 = inlined_call_operand.vmem [shape: f32[20,16], index: 6, kind: input, shape index: {}]   ;;  %s10448_s7 = inlined_call_operand.hbm [shape: f32[8,1,8,128], index: 7, kind: output, shape index: {}]  }
   0x1   :  { %14 = vsyncpa [#allocation3 + $0x1], 0  ;;  %s9880_s24 = smov 0   ;;  %s9882_s25 = smov 0  }
   0x2   :  { %s9884_s26 = smov 0   ;;  %s9886_s27 = smov 0  }
   0x3   :  { %s9888_s28 = smov 0   ;;  %s9890_s29 = smov 0  }
   0x4 LB: > { %s8287_s30 = sadd.s32 4294967295, %s9837_s29   ;;  %s8288_s8 = sadd.s32 4294967294, %s9837_s29   ;;  %s9837_s29 = sphi %s9890_s29, %s20_s29   ;;  %s9833_s28 = sphi %s9888_s28, %s10455_s28   ;;  %s9829_s27 = sphi %s9886_s27, %s10454_s27   ;;  %s9825_s26 = sphi %s9884_s26, %s10453_s26   ;;  %s9821_s25 = sphi %s9882_s25, %s10452_s25   ;;  %s9817_s24 = sphi %s9880_s24, %s10451_s24  }
   0x5   : > { %s32_s9 = sadd.s32 1, %s9833_s28  ;;  %s224_s10 = sadd.s32 1, %s9825_s26 }
   0x6   : > { %p34_p0 = scmp.ge.s32.totalorder %s32_s9, 8  ;;  %p234_p1 = scmp.ne.s32.totalorder %s9825_s26, %s9821_s25 }
   0x7   : > { %p235_p2 = scmp.eq.s32.totalorder %s8287_s30, 7  ;;  %p240_p3 = scmp.ne.s32.totalorder %s9821_s25, %s9817_s24 }
   0x8   : > { %s10457_s9 = smov (%p34_p0, %s32_s9), 0  ;;  %p241_p5 = scmp.eq.s32.totalorder %s8288_s8, 7 }
   0x9   : > { %p9920_p4 = por %p235_p2, %p234_p1  ;;  %s219_s12 = ssub.s32 %s9833_s28, %s10457_s9 }
   0xa   : > { %p8291_p6 = scmp.ge.s32.totalorder %s9837_s29, 1  ;;  %p222_p7 = scmp.eq.s32.totalorder %s219_s12, 0 }
   0xb   : > { %p9927_p8 = por %p241_p5, %p240_p3  ;;  %p340_p9 = scmp.lt.s32.totalorder %s9837_s29, 9 }
   0xc   : > { %s9933_s14 = scalar_select %p222_p7, %s9825_s26, %s224_s10  }
   0xd   : > { %p341_p10 = pnand %p8291_p6, %p340_p9 }
   0xe   : > { %p418_p11 = scmp.lt.s32.totalorder (!%p341_p10), %s9829_s27, 7  ;;  %v481_v0 = vld [vmem:[%s10446_s5] sm:$0xff] (!%p341_p10)  ;;  %vm486_vm0 = vcmask (!%p341_p10), 64512   ;;  %v482_v1 = vld [vmem:[%s10446_s5 + $0x8] sm:$0xff] (!%p341_p10)  ;;  %vm982_vm1 = vcmask (!%p341_p10), 130048   ;;  %vm1498_vm2 = vcmask (!%p341_p10), 1043456  }
   0xf   : > { %344 = sbr.rel (%p341_p10) target bundleno = 2292 (0x8f4), region = 48  ;;  %v488_v2 = vsel (!%p341_p10), %vm486_vm0, %v481_v0, 0  ;;  %v491_v3 = vsel (!%p341_p10), %vm486_vm0, %v482_v1, 0  ;;  %v479_v22 = vld [vmem:[%s10445_s4] sm:$0xff] (!%p341_p10)  ;;  %v480_v27 = vld [vmem:[%s10445_s4 + $0x8] sm:$0xff] (!%p341_p10)  ;;  %vm1491_vm3 = vcmask (!%p341_p10), 162816  }
  0x10   : > { %v9943_v4 = vand.u32 (!%p341_p10), 4294901760, %v488_v2  ;;  %v9945_v5 = vand.u32 (!%p341_p10), 4294901760, %v491_v3  ;;  %v984_v25 = vsel (!%p341_p10), %vm982_vm1, %v479_v22, 0  ;;  %v987_v31 = vsel (!%p341_p10), %vm982_vm1, %v480_v27, 0  ;;  %v483_v50 = vld [vmem:[%s10447_s6] sm:$0xff] (!%p341_p10)  ;;  %v484_v51 = vld [vmem:[%s10447_s6 + $0x8] sm:$0xff] (!%p341_p10) }
  0x11   : > { %v10000_v26 = vand.u32 (!%p341_p10), 4294901760, %v984_v25  ;;  %v10013_v34 = vand.u32 (!%p341_p10), 4294901760, %v987_v31  ;;  %v1503_v52 = vand.u32 (!%p341_p10), 4294901760, %v483_v50  ;;  %v1506_v53 = vand.u32 (!%p341_p10), 4294901760, %v484_v51  ;;  %v485_v55 = vld [vmem:[%s10447_s6 + $0x10] sm:$0xf] (!%p341_p10) }
  0x12   : > { %8672 = vmatprep.mubr.f32.mxu0 (!%p341_p10), %v9943_v4  ;;  %v9951_v6 = vsub.f32 (!%p341_p10), %v488_v2, %v9943_v4  ;;  %v9954_v7 = vsub.f32 (!%p341_p10), %v491_v3, %v9945_v5  ;;  %v1500_v58 = vsel (!%p341_p10), %vm1498_vm2, %v485_v55, 0 }
  0x13   : > { %v10010_v30 = vsub.f32 (!%p341_p10), %v984_v25, %v10000_v26  ;;  %v10020_v39 = vsub.f32 (!%p341_p10), %v987_v31, %v10013_v34  ;;  %v10053_v54 = vpack.c.bf16 (!%p341_p10), %v1506_v53, %v1503_v52  ;;  %v1592_v56 = vsub.f32 (!%p341_p10), %v483_v50, %v1503_v52 }
  0x14   : > { %v9963_v8 = vand.u32 (!%p341_p10), 4294901760, %v9951_v6  ;;  %v9966_v9 = vand.u32 (!%p341_p10), 4294901760, %v9954_v7  ;;  %v1599_v57 = vsub.f32 (!%p341_p10), %v484_v51, %v1506_v53  ;;  %v10059_v59 = vand.u32 (!%p341_p10), 4294901760, %v1500_v58 }
  0x15   : > { %v10016_v35 = vand.u32 (!%p341_p10), 4294901760, %v10010_v30  ;;  %v10026_v43 = vand.u32 (!%p341_p10), 4294901760, %v10020_v39  ;;  %v1593_v60 = vand.u32 (!%p341_p10), 4294901760, %v1592_v56 }
  0x16   : > { %s419_s19 = scalar_select %p418_p11, %s9829_s27, 7  ;;  %v562_v12 = vsub.f32 %v9951_v6, %v9963_v8  ;;  %v572_v13 = vsub.f32 %v9954_v7, %v9966_v9  ;;  %v1600_v61 = vand.u32 4294901760, %v1599_v57  ;;  %v10072_v3 = vpack.c.bf16 %v1599_v57, %v1592_v56 }
  0x17   : > { %v1059_v40 = vsub.f32 %v10010_v30, %v10016_v35  ;;  %v1069_v46 = vsub.f32 %v10020_v39, %v10026_v43  ;;  %v1594_v62 = vsub.f32 %v1592_v56, %v1593_v60  ;;  %v10077_v22 = vsub.f32 %v1500_v58, %v10059_v59 }
  0x18   : > { %s9947_s20 = smul.u32 24, %s419_s19  ;;  %v9976_v16 = vand.u32 4294901760, %v562_v12  ;;  %v9978_v17 = vand.u32 4294901760, %v572_v13  ;;  %v1601_v63 = vsub.f32 %v1599_v57, %v1600_v61 }
  0x19   : > { %v10028_v44 = vand.u32 4294901760, %v1059_v40  ;;  %v10034_v47 = vand.u32 4294901760, %v1069_v46  ;;  %v1595_v0 = vand.u32 4294901760, %v1594_v62 }
  0x1a   : > { %s8302_s21 = sadd.s32 16, %s9947_s20  ;;  %8667 = vmatprep.mubr.f32.mxu1 %v9976_v16  ;;  %s425_s12 = scalar_lea.vmem %s10441_s0, %s9947_s20  ;;  %v1602_v1 = vand.u32 4294901760, %v1601_v63 }
  0x1b   : > { %s440_s30 = scalar_lea.vmem %s10442_s1, %s8302_s21  ;;  %v9988_v20 = vld [vmem:[%s425_s12] sm:$0xff]  ;;  %v9990_v21 = vld [vmem:[%s425_s12 + $0x8] sm:$0xff]  ;;  %s470_s16 = scalar_lea.vmem %s10444_s3, %s8302_s21 }
  0x1c   : > { %v9968_v10 = vld [vmem:[%s440_s30] sm:$0xff]  ;;  %v990_v23 = vand.u32 4294901760, %v9988_v20  ;;  %v993_v24 = vand.u32 4294901760, %v9990_v21  ;;  %v10068_v2 = vpack.c.bf16 %v1602_v1, %v1595_v0  ;;  %s455_s18 = scalar_lea.vmem %s10443_s2, %s9947_s20  ;;  %s410_s20 = sand.u32 1, %s9821_s25  }
  0x1d   : > { %v494_v11 = vand.u32 4294901760, %v9968_v10  ;;  %v10125_v52 = vld [vmem:[%s455_s18] sm:$0xff]  ;;  %v10127_v53 = vld [vmem:[%s455_s18 + $0x8] sm:$0xff]  ;;  %s8292_s19 = sshll.u32 %s410_s20, 3  ;;  %s8298_s30 = sshll.u32 %s9829_s27, 7 }
  0x1e   : > { %v1078_v28 = vsub.f32 %v9988_v20, %v990_v23  ;;  %v1085_v29 = vsub.f32 %v9990_v21, %v993_v24  ;;  %v9295_v36 = vpack.c.bf16 %v993_v24, %v990_v23  ;;  %v2507_v55 = vand.u32 4294901760, %v10125_v52  ;;  %s412_s22 = scalar_lea.vmem [#allocation2], %s8292_s19  ;;  %s10396_s15 = scalar_lea.hbm %s10448_s7, %s8298_s30 }
  0x1f   : > { %v581_v14 = vsub.f32 %v9968_v10, %v494_v11  ;;  %8665 = vmatprep.subr.mxu1 %v494_v11  ;;  %v2510_v56 = vand.u32 4294901760, %v10127_v53  ;;  %s8159_s23 = sshll.u32 %s412_s22, 4  ;;  %s9839_s27 = smov [#allocation2]   ;;  %s10391_s23 = int_to_ptr.vmem [resolvable:$true] %s8159_s23 }
  0x20   : > { %8666 = vmatpush3.msra.mxu1 %v494_v11  ;;  %v1079_v32 = vand.u32 4294901760, %v1078_v28  ;;  %v1086_v33 = vand.u32 4294901760, %v1085_v29  ;;  %v9303_v48 = vpack.c.bf16 %v1085_v29, %v1078_v28  ;;  %v2595_v57 = vsub.f32 %v10125_v52, %v2507_v55  ;;  %s9759_s21 = scalar_lea.vmem %s10391_s23, 128  ;;  %s9763_s17 = sshll.u32 %s9839_s27, 4  ;;  %s9764_s17 = int_to_ptr.vmem [resolvable:$false] %s9763_s17 }
  0x21   : > { %v582_v15 = vand.u32 4294901760, %v581_v14  ;;  %8668 = vmatmul.mubr.f32.vlgmr.msra.gmra.mrb[0].mxu1 %v9978_v17  ;;  %9320 = vmatprep.subr.bf16.mxu1 %v10053_v54  ;;  %v2602_v58 = vsub.f32 %v10127_v53, %v2510_v56  ;;  %v9343_v62 = vpack.c.bf16 %v2510_v56, %v2507_v55  ;;  %p9760_p12 = scmp.ne.s32.totalorder %s10391_s23, %s9759_s21  ;;  %s9765_s18 = scalar_lea.vmem %s9764_s17, 256 }
  0x22   : > { %v1080_v37 = vsub.f32 %v1078_v28, %v1079_v32  ;;  %v1087_v38 = vsub.f32 %v1085_v29, %v1086_v33  ;;  %v9311_v49 = vpack.c.bf16 %v1086_v33, %v1079_v32  ;;  %9322 = vmatpush3.bf16.msra.mxu1 %v10053_v54  ;;  %v10082_v29 = vand.u32 4294901760, %v10077_v22  ;;  %p9766_p1 = scmp.lt.s32.totalorder %s10391_s23, %s9764_s17  ;;  %p9767_p2 = scmp.lt.s32.totalorder %s9765_s18, %s9759_s21 }
  0x23   : > { %v583_v18 = vsub.f32 %v581_v14, %v582_v15  ;;  %8741 = vmatprep.subr.mxu1 %v10059_v59  ;;  %p9761_p13 = pnand %p9760_p12, %p9920_p4 }
  0x24   : > { %v1081_v41 = vand.u32 4294901760, %v1080_v37  ;;  %v1088_v42 = vand.u32 4294901760, %v1087_v38  ;;  %v1608_v37 = vsub.f32 %v10077_v22, %v10082_v29  ;;  %p9768_p3 = por %p9767_p2, %p9766_p1 }
  0x25   : > { %v584_v19 = vand.u32 4294901760, %v583_v18  ;;  %p9762_p0 = pneg %p9761_p13 }
  0x26   : > { %v9299_v45 = vpack.c.bf16 %v1088_v42, %v1081_v41  ;;  %8742 = vmatpush3.msra.mxu1 %v10059_v59  ;;  %v10086_v42 = vand.u32 4294901760, %v1608_v37 }
  0x27   : > { %8670 = vmatprep.subr.mxu0 %v584_v19  ;;  %9324 = vmatprep.subr.bf16.mxu1 %v10068_v2  ;;  %p9769_p5 = pnand %p9768_p3, %p9762_p0 }
  0x28   : > { %8671 = vmatpush3.msra.mxu0 %v584_v19 }
  0x29   : > { %8673 = vmatmul.mubr.f32.vlgmr.msra.gmra.mrb[0].mxu0 %v9945_v5  ;;  %8675 = vmatprep.subr.mxu0 %v581_v14 }
  0x2a   : > { %8676 = vmatpush3.msra.mxu0 %v581_v14  ;;  %8677 = vmatprep.mubr.f32.mxu0 %v9951_v6 }
  0x2b   : > { %8680 = vmatprep.subr.mxu0 %v494_v11 }
  0x31   : > { %8678 = vmatmul.mubr.f32.vlgmr.msra.gmra.mrb[0].mxu0 %v9954_v7 }
  0x32   : > { %8681 = vmatpush3.msra.mxu0 %v494_v11  ;;  %8682 = vmatprep.mubr.f32.mxu0 %v9963_v8 }
  0x33   : > { %8685 = vmatprep.subr.mxu0 %v582_v15 }
  0x39   : > { %8683 = vmatmul.mubr.f32.vlgmr.msra.gmra.mrb[0].mxu0 %v9966_v9 }
  0x3a   : > { %8686 = vmatpush3.msra.mxu0 %v582_v15  ;;  %8687 = vmatprep.mubr.f32.mxu0 %v9943_v4 }
  0x3b   : > { %8690 = vmatprep.subr.mxu0 %v494_v11 }
  0x41   : > { %8688 = vmatmul.mubr.f32.vlgmr.msra.gmra.mrb[0].mxu0 %v9945_v5 }
  0x42   : > { %8691 = vmatpush3.msra.mxu0 %v494_v11  ;;  %8692 = vmatprep.mubr.f32.mxu0 %v9943_v4  ;;  %v10074_v11 = vpack.c.bf16 %v1600_v61, %v1593_v60  ;;  %v2596_v60 = vand.u32 4294901760, %v2595_v57  ;;  %v2603_v61 = vand.u32 4294901760, %v2602_v58 }
  0x43   : > { %9296 = vmatprep.subr.bf16.mxu0 %v9295_v36 }
  0x44   : > { %v2597_v63 = vsub.f32 %v2595_v57, %v2596_v60  ;;  %v2604_v0 = vsub.f32 %v2602_v58, %v2603_v61 }
  0x46   : > { %v2598_v1 = vand.u32 4294901760, %v2597_v63 }
  0x49   : > { %8693 = vmatmul.mubr.f32.vlgmr.msra.gmra.mrb[0].mxu0 %v9945_v5 }
  0x4a   : > { %9298 = vmatpush3.bf16.msra.mxu0 %v9295_v36  ;;  %8699 = vmatprep.mubr.f32.mxu0 %v10028_v44 }
  0x4b   : > { %9300 = vmatprep.subr.bf16.mxu0 %v9299_v45 }
  0x51   : > { %8700 = vmatmul.mubr.f32.vlgmr.msra.gmra.mrb[0].mxu0 %v10034_v47 }
  0x52   : > { %9302 = vmatpush3.bf16.msra.mxu0 %v9299_v45  ;;  %8706 = vmatprep.mubr.f32.mxu0 %v10000_v26  ;;  %v10103_v45 = vld [vmem:[%s470_s16] sm:$0xff]  ;;  %s8145_s16 = scalar_lea.sflag [#allocation3], %s410_s20 }
  0x53   : > { %9304 = vmatprep.subr.bf16.mxu0 %v9303_v48  ;;  %v2018_v46 = vand.u32 4294901760, %v10103_v45 }
  0x59   : > { %8707 = vmatmul.mubr.f32.vlgmr.msra.gmra.mrb[0].mxu0 %v10013_v34 }
  0x5a   : > { %9306 = vmatpush3.bf16.msra.mxu0 %v9303_v48  ;;  %8713 = vmatprep.mubr.f32.mxu0 %v10010_v30  ;;  %v2105_v48 = vsub.f32 %v10103_v45, %v2018_v46 }
  0x5b   : > { %9308 = vmatprep.subr.bf16.mxu0 %v9295_v36 }
  0x61   : > { %8714 = vmatmul.mubr.f32.vlgmr.msra.gmra.mrb[0].mxu0 %v10020_v39 }
  0x62   : > { %9310 = vmatpush3.bf16.msra.mxu0 %v9295_v36  ;;  %8720 = vmatprep.mubr.f32.mxu0 %v10016_v35 }
  0x63   : > { %9312 = vmatprep.subr.bf16.mxu0 %v9311_v49 }
  0x69   : > { %8721 = vmatmul.mubr.f32.vlgmr.msra.gmra.mrb[0].mxu0 %v10026_v43 }
  0x6a   : > { %9314 = vmatpush3.bf16.msra.mxu0 %v9311_v49  ;;  %8727 = vmatprep.mubr.f32.mxu0 %v10000_v26  ;;  %v2106_v49 = vand.u32 4294901760, %v2105_v48 }
  0x6b   : > { %9316 = vmatprep.subr.bf16.mxu0 %v9295_v36 }
  0x6c   : > { %v2107_v50 = vsub.f32 %v2105_v48, %v2106_v49 }
  0x6e   : > { %v2108_v51 = vand.u32 4294901760, %v2107_v50 }
  0x71   : > { %8728 = vmatmul.mubr.f32.vlgmr.msra.gmra.mrb[0].mxu0 %v10013_v34 }
  0x72   : > { %9318 = vmatpush3.bf16.msra.mxu0 %v9295_v36  ;;  %8734 = vmatprep.mubr.f32.mxu0 %v10000_v26 }
  0x73   : > { %9368 = vmatprep.subr.bf16.mxu0 %v10053_v54 }
  0x79   : > { %8735 = vmatmul.mubr.f32.vlgmr.msra.gmra.mrb[0].mxu0 %v10013_v34 }
  0x7a   : > { %9370 = vmatpush3.bf16.msra.mxu0 %v10053_v54 }
  0x7b   : > { %8867 = vmatprep.subr.mxu0 %v10059_v59 }
  0x7e   : > { %8868 = vmatpush3.msra.mxu0 %v10059_v59 }
  0x7f   : > { %9372 = vmatprep.subr.bf16.mxu0 %v10068_v2 }
  0xf4   : > { %v8669_v12 = vpop.f32.mrb[0].mxu1 }
  0xf5   : > { %v565_v13 = vpop.f32.mrb[1].mxu1 }
 0x14c   : > { %v8736_v14 = vpop.f32.mrb[0].mxu0 }
 0x14d   : > { %v9535_v15 = vadd.f32 %v8736_v14, %v8669_v12  ;;  %v1481_v18 = vpop.f32.mrb[1].mxu0  ;;  %v2605_v12 = vand.u32 4294901760, %v2604_v0  ;;  %v9351_v14 = vpack.c.bf16 %v2602_v58, %v2595_v57  ;;  %v3529_v57 = vmul.f32 %v10125_v52, %v9988_v20 }
 0x14e   : > { %v9536_v19 = vadd.f32 %v1481_v18, %v565_v13  ;;  %v3530_v58 = vmul.f32 %v10127_v53, %v9990_v21 }
 0x14f   : > { %v1496_v23 = vsel %vm1491_vm3, %v9535_v15, 0  ;;  %v9347_v13 = vpack.c.bf16 %v2605_v12, %v2598_v1  ;;  %v9359_v15 = vpack.c.bf16 %v2603_v61, %v2596_v60  ;;  %v4022_v60 = vand.u32 4294901760, %v3529_v57 }
 0x150   : > { %v1580_v24 = vand.u32 4294901760, %v1496_v23  ;;  %v1493_v25 = vsel %vm1491_vm3, %v9536_v19, 0  ;;  %v4025_v61 = vand.u32 4294901760, %v3530_v58 }
 0x151   : > { %v1570_v27 = vand.u32 4294901760, %v1493_v25 }
 0x152   : > { %v1581_v28 = vsub.f32 %v1496_v23, %v1580_v24  ;;  %v4117_v63 = vsub.f32 %v3530_v58, %v4025_v61  ;;  %v9391_v12 = vpack.c.bf16 %v4025_v61, %v4022_v60 }
 0x153   : > { %v1571_v31 = vsub.f32 %v1493_v25, %v1570_v27 }
 0x154   : > { %v1582_v32 = vand.u32 4294901760, %v1581_v28  ;;  %v4118_v1 = vand.u32 4294901760, %v4117_v63 }
 0x155   : > { %v1572_v33 = vand.u32 4294901760, %v1571_v31 }
 0x156   : > { %v1583_v36 = vsub.f32 %v1581_v28, %v1582_v32 }
 0x157   : > { %v1573_v38 = vsub.f32 %v1571_v31, %v1572_v33 }
 0x158   : > { %v1584_v41 = vand.u32 4294901760, %v1583_v36 }
 0x159   : > { %v1574_v40 = vand.u32 4294901760, %v1573_v38 }
 0x15b   : > { %8743 = vmatprep.mubr.f32.mxu1 %v1574_v40 }
 0x15c   : > { %8744 = vmatmul.mubr.f32.vlgmr.msra.gmra.mrb[2].mxu1 %v1584_v41 }
 0x15d   : > { %9326 = vmatpush3.bf16.msra.mxu1 %v10068_v2  ;;  %8752 = vmatprep.mubr.f32.mxu1 %v1570_v27 }
 0x15e   : > { %8750 = vmatprep.subr.mxu1 %v10086_v42 }
 0x161   : > { %8751 = vmatpush3.msra.mxu1 %v10086_v42 }
 0x162   : > { %9328 = vmatprep.subr.bf16.mxu1 %v10072_v3 }
 0x164   : > { %8753 = vmatmul.mubr.f32.vlgmr.msra.gmra.mrb[2].mxu1 %v1580_v24 }
 0x165   : > { %9330 = vmatpush3.bf16.msra.mxu1 %v10072_v3  ;;  %8761 = vmatprep.mubr.f32.mxu1 %v1571_v31 }
 0x166   : > { %8759 = vmatprep.subr.mxu1 %v10077_v22 }
 0x169   : > { %8760 = vmatpush3.msra.mxu1 %v10077_v22 }
 0x16a   : > { %9332 = vmatprep.subr.bf16.mxu1 %v10053_v54 }
 0x16c   : > { %8762 = vmatmul.mubr.f32.vlgmr.msra.gmra.mrb[2].mxu1 %v1581_v28 }
 0x16d   : > { %9334 = vmatpush3.bf16.msra.mxu1 %v10053_v54  ;;  %8770 = vmatprep.mubr.f32.mxu1 %v1572_v33 }
 0x16e   : > { %8768 = vmatprep.subr.mxu1 %v10059_v59 }
 0x171   : > { %8769 = vmatpush3.msra.mxu1 %v10059_v59 }
 0x172   : > { %9336 = vmatprep.subr.bf16.mxu1 %v10074_v11 }
 0x174   : > { %8771 = vmatmul.mubr.f32.vlgmr.msra.gmra.mrb[2].mxu1 %v1582_v32 }
 0x175   : > { %9338 = vmatpush3.bf16.msra.mxu1 %v10074_v11  ;;  %8779 = vmatprep.mubr.f32.mxu1 %v1570_v27 }
 0x176   : > { %8777 = vmatprep.subr.mxu1 %v10082_v29 }
 0x179   : > { %8778 = vmatpush3.msra.mxu1 %v10082_v29 }
 0x17a   : > { %9340 = vmatprep.subr.bf16.mxu1 %v10053_v54 }
 0x17c   : > { %8780 = vmatmul.mubr.f32.vlgmr.msra.gmra.mrb[2].mxu1 %v1580_v24 }
 0x17d   : > { %9342 = vmatpush3.bf16.msra.mxu1 %v10053_v54  ;;  %8788 = vmatprep.mubr.f32.mxu1 %v1570_v27 }
 0x17e   : > { %8786 = vmatprep.subr.mxu1 %v10059_v59 }
 0x181   : > { %8787 = vmatpush3.msra.mxu1 %v10059_v59 }
 0x182   : > { %8791 = vmatprep.subr.mxu1 %v2018_v46 }
 0x184   : > { %8789 = vmatmul.mubr.f32.vlgmr.msra.gmra.mrb[2].mxu1 %v1580_v24 }
 0x185   : > { %8792 = vmatpush3.msra.mxu1 %v2018_v46  ;;  %8793 = vmatprep.mubr.f32.mxu1 %v9976_v16 }
 0x186   : > { %8796 = vmatprep.subr.mxu1 %v2108_v51 }
 0x188   : > { %8794 = vmatmul.mubr.f32.vlgmr.msra.gmra.mrb[4].mxu1 %v9978_v17 }
 0x189   : > { %8797 = vmatpush3.msra.mxu1 %v2108_v51  ;;  %8798 = vmatprep.mubr.f32.mxu1 %v9943_v4 }
 0x18a   : > { %8801 = vmatprep.subr.mxu1 %v2105_v48 }
 0x190   : > { %8799 = vmatmul.mubr.f32.vlgmr.msra.gmra.mrb[4].mxu1 %v9945_v5 }
 0x191   : > { %8802 = vmatpush3.msra.mxu1 %v2105_v48  ;;  %8803 = vmatprep.mubr.f32.mxu1 %v9951_v6  ;;  %v3531_v48 = vmul.f32 %v10103_v45, %v9968_v10 }
 0x192   : > { %8806 = vmatprep.subr.mxu1 %v2018_v46 }
 0x198   : > { %8804 = vmatmul.mubr.f32.vlgmr.msra.gmra.mrb[4].mxu1 %v9954_v7 }
 0x199   : > { %8807 = vmatpush3.msra.mxu1 %v2018_v46  ;;  %8808 = vmatprep.mubr.f32.mxu1 %v9963_v8 }
 0x19a   : > { %8811 = vmatprep.subr.mxu1 %v2106_v49 }
 0x1a0   : > { %8809 = vmatmul.mubr.f32.vlgmr.msra.gmra.mrb[4].mxu1 %v9966_v9 }
 0x1a1   : > { %8812 = vmatpush3.msra.mxu1 %v2106_v49  ;;  %8813 = vmatprep.mubr.f32.mxu1 %v9943_v4  ;;  %v3533_v49 = vand.u32 4294901760, %v3531_v48 }
 0x1a2   : > { %8816 = vmatprep.subr.mxu1 %v2018_v46 }
 0x1a3   : > { %v3620_v50 = vsub.f32 %v3531_v48, %v3533_v49 }
 0x1a5   : > { %v3621_v51 = vand.u32 4294901760, %v3620_v50 }
 0x1a7   : > { %v3622_v55 = vsub.f32 %v3620_v50, %v3621_v51 }
 0x1a8   : > { %8814 = vmatmul.mubr.f32.vlgmr.msra.gmra.mrb[4].mxu1 %v9945_v5 }
 0x1a9   : > { %8817 = vmatpush3.msra.mxu1 %v2018_v46  ;;  %8818 = vmatprep.mubr.f32.mxu1 %v9943_v4  ;;  %v3623_v56 = vand.u32 4294901760, %v3622_v55 }
 0x1aa   : > { %9344 = vmatprep.subr.bf16.mxu1 %v9343_v62 }
 0x1b0   : > { %8819 = vmatmul.mubr.f32.vlgmr.msra.gmra.mrb[4].mxu1 %v9945_v5 }
 0x1b1   : > { %9346 = vmatpush3.bf16.msra.mxu1 %v9343_v62  ;;  %8825 = vmatprep.mubr.f32.mxu1 %v10028_v44 }
 0x1b2   : > { %9348 = vmatprep.subr.bf16.mxu1 %v9347_v13 }
 0x1b8   : > { %8826 = vmatmul.mubr.f32.vlgmr.msra.gmra.mrb[4].mxu1 %v10034_v47 }
 0x1b9   : > { %9350 = vmatpush3.bf16.msra.mxu1 %v9347_v13  ;;  %8832 = vmatprep.mubr.f32.mxu1 %v10000_v26 }
 0x1ba   : > { %9352 = vmatprep.subr.bf16.mxu1 %v9351_v14 }
 0x1c0   : > { %8833 = vmatmul.mubr.f32.vlgmr.msra.gmra.mrb[4].mxu1 %v10013_v34 }
 0x1c1   : > { %9354 = vmatpush3.bf16.msra.mxu1 %v9351_v14  ;;  %8839 = vmatprep.mubr.f32.mxu1 %v10010_v30  ;;  %v4119_v14 = vsub.f32 %v4117_v63, %v4118_v1 }
 0x1c2   : > { %9356 = vmatprep.subr.bf16.mxu1 %v9343_v62 }
 0x1c8   : > { %8840 = vmatmul.mubr.f32.vlgmr.msra.gmra.mrb[4].mxu1 %v10020_v39 }
 0x1c9   : > { %9358 = vmatpush3.bf16.msra.mxu1 %v9343_v62  ;;  %8846 = vmatprep.mubr.f32.mxu1 %v10016_v35 }
 0x1ca   : > { %9360 = vmatprep.subr.bf16.mxu1 %v9359_v15 }
 0x1d0   : > { %8847 = vmatmul.mubr.f32.vlgmr.msra.gmra.mrb[4].mxu1 %v10026_v43 }
 0x1d1   : > { %9362 = vmatpush3.bf16.msra.mxu1 %v9359_v15  ;;  %8853 = vmatprep.mubr.f32.mxu1 %v10000_v26 }
 0x1d2   : > { %9364 = vmatprep.subr.bf16.mxu1 %v9343_v62 }
 0x1d8   : > { %8854 = vmatmul.mubr.f32.vlgmr.msra.gmra.mrb[4].mxu1 %v10013_v34 }
 0x1d9   : > { %9366 = vmatpush3.bf16.msra.mxu1 %v9343_v62  ;;  %8860 = vmatprep.mubr.f32.mxu1 %v10000_v26  ;;  %v4110_v62 = vsub.f32 %v3529_v57, %v4022_v60 }
 0x1da   : > { %9416 = vmatprep.subr.bf16.mxu1 %v10053_v54 }
 0x1db   : > { %v4111_v0 = vand.u32 4294901760, %v4110_v62 }
 0x1dd   : > { %v4112_v13 = vsub.f32 %v4110_v62, %v4111_v0 }
 0x1df   : > { %v4113_v15 = vand.u32 4294901760, %v4112_v13 }
 0x1e0   : > { %8861 = vmatmul.mubr.f32.vlgmr.msra.gmra.mrb[4].mxu1 %v10013_v34 }
 0x1e1   : > { %9418 = vmatpush3.bf16.msra.mxu1 %v10053_v54 }
 0x1e2   : > { %8993 = vmatprep.subr.mxu1 %v10059_v59 }
 0x1e5   : > { %8994 = vmatpush3.msra.mxu1 %v10059_v59 }
 0x1e6   : > { %9420 = vmatprep.subr.bf16.mxu1 %v10068_v2 }
 0x257   : > { %v10157_v18 = vpop.f32.mrb[2].mxu1 }
 0x258   : > { %v10159_v19 = vpop.f32.mrb[3].mxu1 }
 0x2b3   : > { %v8862_v23 = vpop.f32.mrb[4].mxu1 }
 0x2b4   : > { %v3012_v24 = vsel %vm1491_vm3, %v8862_v23, 0  ;;  %v2998_v25 = vpop.f32.mrb[5].mxu1  ;;  %v4120_v23 = vand.u32 4294901760, %v4119_v14 }
 0x2b5   : > { %v3092_v27 = vand.u32 4294901760, %v3012_v24  ;;  %v3009_v28 = vsel %vm1491_vm3, %v2998_v25, 0  ;;  %v9399_v25 = vpack.c.bf16 %v4117_v63, %v4110_v62 }
 0x2b6   : > { %v3082_v31 = vand.u32 4294901760, %v3009_v28 }
 0x2b7   : > { %v3093_v32 = vsub.f32 %v3012_v24, %v3092_v27  ;;  %v9395_v24 = vpack.c.bf16 %v4120_v23, %v4113_v15  ;;  %v5044_v15 = vmul.f32 %v9988_v20, %v9988_v20  ;;  %v5045_v23 = vmul.f32 %v9990_v21, %v9990_v21 }
 0x2b8   : > { %v3083_v33 = vsub.f32 %v3009_v28, %v3082_v31 }
 0x2b9   : > { %v3094_v36 = vand.u32 4294901760, %v3093_v32 }
 0x2ba   : > { %v3084_v37 = vand.u32 4294901760, %v3083_v33 }
 0x2bb   : > { %v3095_v38 = vsub.f32 %v3093_v32, %v3094_v36 }
 0x2bc   : > { %v3085_v40 = vsub.f32 %v3083_v33, %v3084_v37 }
 0x2bd   : > { %v3096_v46 = vand.u32 4294901760, %v3095_v38 }
 0x2be   : > { %v3086_v41 = vand.u32 4294901760, %v3085_v40 }
 0x2c0   : > { %8869 = vmatprep.mubr.f32.mxu0 %v3086_v41 }
 0x2c1   : > { %8870 = vmatmul.mubr.f32.vlgmr.msra.gmra.mrb[2].mxu0 %v3096_v46 }
 0x2c2   : > { %9374 = vmatpush3.bf16.msra.mxu0 %v10068_v2  ;;  %8878 = vmatprep.mubr.f32.mxu0 %v3082_v31 }
 0x2c3   : > { %8876 = vmatprep.subr.mxu0 %v10086_v42 }
 0x2c6   : > { %8877 = vmatpush3.msra.mxu0 %v10086_v42 }
 0x2c7   : > { %9376 = vmatprep.subr.bf16.mxu0 %v10072_v3 }
 0x2c9   : > { %8879 = vmatmul.mubr.f32.vlgmr.msra.gmra.mrb[2].mxu0 %v3092_v27 }
 0x2ca   : > { %9378 = vmatpush3.bf16.msra.mxu0 %v10072_v3  ;;  %8887 = vmatprep.mubr.f32.mxu0 %v3083_v33 }
 0x2cb   : > { %8885 = vmatprep.subr.mxu0 %v10077_v22 }
 0x2ce   : > { %8886 = vmatpush3.msra.mxu0 %v10077_v22 }
 0x2cf   : > { %9380 = vmatprep.subr.bf16.mxu0 %v10053_v54 }
 0x2d1   : > { %8888 = vmatmul.mubr.f32.vlgmr.msra.gmra.mrb[2].mxu0 %v3093_v32 }
 0x2d2   : > { %9382 = vmatpush3.bf16.msra.mxu0 %v10053_v54  ;;  %8896 = vmatprep.mubr.f32.mxu0 %v3084_v37  ;;  %v10228_v37 = vmul.f32 %v10159_v19, %v10159_v19 }
 0x2d3   : > { %8894 = vmatprep.subr.mxu0 %v10059_v59 }
 0x2d6   : > { %8895 = vmatpush3.msra.mxu0 %v10059_v59 }
 0x2d7   : > { %9384 = vmatprep.subr.bf16.mxu0 %v10074_v11 }
 0x2d9   : > { %8897 = vmatmul.mubr.f32.vlgmr.msra.gmra.mrb[2].mxu0 %v3094_v36 }
 0x2da   : > { %9386 = vmatpush3.bf16.msra.mxu0 %v10074_v11  ;;  %8905 = vmatprep.mubr.f32.mxu0 %v3082_v31 }
 0x2db   : > { %8903 = vmatprep.subr.mxu0 %v10082_v29 }
 0x2de   : > { %8904 = vmatpush3.msra.mxu0 %v10082_v29 }
 0x2df   : > { %9388 = vmatprep.subr.bf16.mxu0 %v10053_v54 }
 0x2e1   : > { %8906 = vmatmul.mubr.f32.vlgmr.msra.gmra.mrb[2].mxu0 %v3092_v27 }
 0x2e2   : > { %9390 = vmatpush3.bf16.msra.mxu0 %v10053_v54  ;;  %8914 = vmatprep.mubr.f32.mxu0 %v3082_v31  ;;  %v10219_v31 = vmul.f32 %v10157_v18, %v10157_v18 }
 0x2e3   : > { %8912 = vmatprep.subr.mxu0 %v10059_v59 }
 0x2e6   : > { %8913 = vmatpush3.msra.mxu0 %v10059_v59 }
 0x2e7   : > { %8917 = vmatprep.subr.mxu0 %v3533_v49 }
 0x2e9   : > { %8915 = vmatmul.mubr.f32.vlgmr.msra.gmra.mrb[2].mxu0 %v3092_v27  ;;  %v9407_v27 = vpack.c.bf16 %v4118_v1, %v4111_v0  ;;  %v5046_v0 = vmul.f32 %v9968_v10, %v9968_v10 }
 0x2ea   : > { %8918 = vmatpush3.msra.mxu0 %v3533_v49  ;;  %8919 = vmatprep.mubr.f32.mxu0 %v9976_v16 }
 0x2eb   : > { %8922 = vmatprep.subr.mxu0 %v3623_v56  ;;  %v5048_v1 = vand.u32 4294901760, %v5046_v0 }
 0x2ed   : > { %8920 = vmatmul.mubr.f32.vlgmr.msra.gmra.mrb[4].mxu0 %v9978_v17 }
 0x2ee   : > { %8923 = vmatpush3.msra.mxu0 %v3623_v56  ;;  %8924 = vmatprep.mubr.f32.mxu0 %v9943_v4 }
 0x2ef   : > { %8927 = vmatprep.subr.mxu0 %v3620_v50 }
 0x2f5   : > { %8925 = vmatmul.mubr.f32.vlgmr.msra.gmra.mrb[4].mxu0 %v9945_v5 }
 0x2f6   : > { %8928 = vmatpush3.msra.mxu0 %v3620_v50  ;;  %8929 = vmatprep.mubr.f32.mxu0 %v9951_v6 }
 0x2f7   : > { %8932 = vmatprep.subr.mxu0 %v3533_v49 }
 0x2fd   : > { %8930 = vmatmul.mubr.f32.vlgmr.msra.gmra.mrb[4].mxu0 %v9954_v7 }
 0x2fe   : > { %8933 = vmatpush3.msra.mxu0 %v3533_v49  ;;  %8934 = vmatprep.mubr.f32.mxu0 %v9963_v8 }
 0x2ff   : > { %8937 = vmatprep.subr.mxu0 %v3621_v51 }
 0x305   : > { %8935 = vmatmul.mubr.f32.vlgmr.msra.gmra.mrb[4].mxu0 %v9966_v9 }
 0x306   : > { %8938 = vmatpush3.msra.mxu0 %v3621_v51  ;;  %8939 = vmatprep.mubr.f32.mxu0 %v9943_v4 }
 0x307   : > { %8942 = vmatprep.subr.mxu0 %v3533_v49 }
 0x30d   : > { %8940 = vmatmul.mubr.f32.vlgmr.msra.gmra.mrb[4].mxu0 %v9945_v5 }
 0x30e   : > { %8943 = vmatpush3.msra.mxu0 %v3533_v49  ;;  %8944 = vmatprep.mubr.f32.mxu0 %v9943_v4 }
 0x30f   : > { %9392 = vmatprep.subr.bf16.mxu0 %v9391_v12 }
 0x315   : > { %8945 = vmatmul.mubr.f32.vlgmr.msra.gmra.mrb[4].mxu0 %v9945_v5 }
 0x316   : > { %9394 = vmatpush3.bf16.msra.mxu0 %v9391_v12  ;;  %8951 = vmatprep.mubr.f32.mxu0 %v10028_v44 }
 0x317   : > { %9396 = vmatprep.subr.bf16.mxu0 %v9395_v24 }
 0x31d   : > { %8952 = vmatmul.mubr.f32.vlgmr.msra.gmra.mrb[4].mxu0 %v10034_v47 }
 0x31e   : > { %9398 = vmatpush3.bf16.msra.mxu0 %v9395_v24  ;;  %8958 = vmatprep.mubr.f32.mxu0 %v10000_v26  ;;  %v5537_v24 = vand.u32 4294901760, %v5044_v15 }
 0x31f   : > { %9400 = vmatprep.subr.bf16.mxu0 %v9399_v25 }
 0x325   : > { %8959 = vmatmul.mubr.f32.vlgmr.msra.gmra.mrb[4].mxu0 %v10013_v34 }
 0x326   : > { %9402 = vmatpush3.bf16.msra.mxu0 %v9399_v25  ;;  %8965 = vmatprep.mubr.f32.mxu0 %v10010_v30  ;;  %v5540_v25 = vand.u32 4294901760, %v5045_v23 }
 0x327   : > { %9404 = vmatprep.subr.bf16.mxu0 %v9391_v12 }
 0x32d   : > { %8966 = vmatmul.mubr.f32.vlgmr.msra.gmra.mrb[4].mxu0 %v10020_v39 }
 0x32e   : > { %9406 = vmatpush3.bf16.msra.mxu0 %v9391_v12  ;;  %8972 = vmatprep.mubr.f32.mxu0 %v10016_v35 }
 0x32f   : > { %9408 = vmatprep.subr.bf16.mxu0 %v9407_v27 }
 0x335   : > { %8973 = vmatmul.mubr.f32.vlgmr.msra.gmra.mrb[4].mxu0 %v10026_v43 }
 0x336   : > { %9410 = vmatpush3.bf16.msra.mxu0 %v9407_v27  ;;  %8979 = vmatprep.mubr.f32.mxu0 %v10000_v26  ;;  %v5625_v27 = vsub.f32 %v5044_v15, %v5537_v24 }
 0x337   : > { %9412 = vmatprep.subr.bf16.mxu0 %v9391_v12 }
 0x338   : > { %v5626_v20 = vand.u32 4294901760, %v5625_v27 }
 0x33a   : > { %v5627_v21 = vsub.f32 %v5625_v27, %v5626_v20 }
 0x33d   : > { %8980 = vmatmul.mubr.f32.vlgmr.msra.gmra.mrb[4].mxu0 %v10013_v34 }
 0x33e   : > { %9414 = vmatpush3.bf16.msra.mxu0 %v9391_v12  ;;  %8986 = vmatprep.mubr.f32.mxu0 %v10000_v26  ;;  %v5135_v12 = vsub.f32 %v5046_v0, %v5048_v1 }
 0x33f   : > { %9464 = vmatprep.subr.bf16.mxu0 %v10053_v54 }
 0x340   : > { %v5136_v13 = vand.u32 4294901760, %v5135_v12 }
 0x342   : > { %v5137_v10 = vsub.f32 %v5135_v12, %v5136_v13 }
 0x344   : > { %v5138_v14 = vand.u32 4294901760, %v5137_v10 }
 0x345   : > { %8987 = vmatmul.mubr.f32.vlgmr.msra.gmra.mrb[4].mxu0 %v10013_v34 }
 0x346   : > { %9466 = vmatpush3.bf16.msra.mxu0 %v10053_v54 }
 0x347   : > { %9119 = vmatprep.subr.mxu0 %v10059_v59 }
 0x34a   : > { %9120 = vmatpush3.msra.mxu0 %v10059_v59 }
 0x34b   : > { %9468 = vmatprep.subr.bf16.mxu0 %v10068_v2 }
 0x3bc   : > { %v8916_v28 = vpop.f32.mrb[2].mxu0 }
 0x3bd   : > { %v10222_v32 = vmul.f32 %v8916_v28, %v10157_v18  ;;  %v10224_v33 = vmul.f32 %v8916_v28, %v8916_v28  ;;  %v3519_v36 = vpop.f32.mrb[3].mxu0  ;;  %v5632_v28 = vsub.f32 %v5045_v23, %v5540_v25 }
 0x3be   : > { %v10231_v38 = vmul.f32 %v3519_v36, %v10159_v19  ;;  %v10233_v40 = vmul.f32 %v3519_v36, %v3519_v36 }
 0x3bf   : > { %v10237_v41 = vadd.f32 %v10224_v33, %v10219_v31  ;;  %v5633_v36 = vand.u32 4294901760, %v5632_v28 }
 0x3c0   : > { %v10241_v18 = vadd.f32 %v10233_v40, %v10228_v37 }
 0x418   : > { %v8988_v46 = vpop.f32.mrb[4].mxu0 }
 0x419   : > { %v4527_v48 = vsel %vm1491_vm3, %v8988_v46, 0  ;;  %v4513_v49 = vpop.f32.mrb[5].mxu0  ;;  %v9439_v46 = vpack.c.bf16 %v5540_v25, %v5537_v24 }
 0x41a   : > { %v4607_v50 = vand.u32 4294901760, %v4527_v48  ;;  %v4524_v51 = vsel %vm1491_vm3, %v4513_v49, 0  ;;  %v5628_v49 = vand.u32 4294901760, %v5627_v21 }
 0x41b   : > { %v4597_v55 = vand.u32 4294901760, %v4524_v51 }
 0x41c   : > { %v4608_v19 = vsub.f32 %v4527_v48, %v4607_v50  ;;  %v5634_v48 = vsub.f32 %v5632_v28, %v5633_v36 }
 0x41d   : > { %v4598_v56 = vsub.f32 %v4524_v51, %v4597_v55 }
 0x41e   : > { %v4609_v57 = vand.u32 4294901760, %v4608_v19 }
 0x41f   : > { %v4599_v58 = vand.u32 4294901760, %v4598_v56 }
 0x420   : > { %v4610_v60 = vsub.f32 %v4608_v19, %v4609_v57 }
 0x421   : > { %v4600_v61 = vsub.f32 %v4598_v56, %v4599_v58 }
 0x422   : > { %v4611_v63 = vand.u32 4294901760, %v4610_v60 }
 0x423   : > { %v4601_v62 = vand.u32 4294901760, %v4600_v61  ;;  %v8080_v61 = vmul.f32 2.0, %v10231_v38 }
 0x425   : > { %8995 = vmatprep.mubr.f32.mxu1 %v4601_v62 }
 0x426   : > { %8996 = vmatmul.mubr.f32.vlgmr.msra.gmra.mrb[6].mxu1 %v4611_v63 }
 0x427   : > { %9422 = vmatpush3.bf16.msra.mxu1 %v10068_v2  ;;  %9004 = vmatprep.mubr.f32.mxu1 %v4597_v55 }
 0x428   : > { %9002 = vmatprep.subr.mxu1 %v10086_v42 }
 0x42b   : > { %9003 = vmatpush3.msra.mxu1 %v10086_v42 }
 0x42c   : > { %9424 = vmatprep.subr.bf16.mxu1 %v10072_v3 }
 0x42e   : > { %9005 = vmatmul.mubr.f32.vlgmr.msra.gmra.mrb[6].mxu1 %v4607_v50 }
 0x42f   : > { %9426 = vmatpush3.bf16.msra.mxu1 %v10072_v3  ;;  %9013 = vmatprep.mubr.f32.mxu1 %v4598_v56 }
 0x430   : > { %9011 = vmatprep.subr.mxu1 %v10077_v22 }
 0x433   : > { %9012 = vmatpush3.msra.mxu1 %v10077_v22 }
 0x434   : > { %9428 = vmatprep.subr.bf16.mxu1 %v10053_v54 }
 0x436   : > { %9014 = vmatmul.mubr.f32.vlgmr.msra.gmra.mrb[6].mxu1 %v4608_v19  ;;  %v9455_v19 = vpack.c.bf16 %v5633_v36, %v5626_v20 }
 0x437   : > { %9430 = vmatpush3.bf16.msra.mxu1 %v10053_v54  ;;  %9022 = vmatprep.mubr.f32.mxu1 %v4599_v58 }
 0x438   : > { %9020 = vmatprep.subr.mxu1 %v10059_v59 }
 0x43b   : > { %9021 = vmatpush3.msra.mxu1 %v10059_v59 }
 0x43c   : > { %9432 = vmatprep.subr.bf16.mxu1 %v10074_v11 }
 0x43e   : > { %9023 = vmatmul.mubr.f32.vlgmr.msra.gmra.mrb[6].mxu1 %v4609_v57  ;;  %v8081_v57 = vmul.f32 2.0, %v10222_v32 }
 0x43f   : > { %9434 = vmatpush3.bf16.msra.mxu1 %v10074_v11  ;;  %9031 = vmatprep.mubr.f32.mxu1 %v4597_v55 }
 0x440   : > { %9029 = vmatprep.subr.mxu1 %v10082_v29 }
 0x443   : > { %9030 = vmatpush3.msra.mxu1 %v10082_v29 }
 0x444   : > { %9436 = vmatprep.subr.bf16.mxu1 %v10053_v54 }
 0x446   : > { %9032 = vmatmul.mubr.f32.vlgmr.msra.gmra.mrb[6].mxu1 %v4607_v50 }
 0x447   : > { %9438 = vmatpush3.bf16.msra.mxu1 %v10053_v54  ;;  %9040 = vmatprep.mubr.f32.mxu1 %v4597_v55  ;;  %v9447_v55 = vpack.c.bf16 %v5632_v28, %v5625_v27 }
 0x448   : > { %9038 = vmatprep.subr.mxu1 %v10059_v59 }
 0x44b   : > { %9039 = vmatpush3.msra.mxu1 %v10059_v59 }
 0x44c   : > { %9043 = vmatprep.subr.mxu1 %v5048_v1 }
 0x44e   : > { %9041 = vmatmul.mubr.f32.vlgmr.msra.gmra.mrb[6].mxu1 %v4607_v50  ;;  %v5635_v50 = vand.u32 4294901760, %v5634_v48 }
 0x44f   : > { %9044 = vmatpush3.msra.mxu1 %v5048_v1  ;;  %9045 = vmatprep.mubr.f32.mxu1 %v9976_v16 }
 0x450   : > { %9048 = vmatprep.subr.mxu1 %v5138_v14  ;;  %v9443_v51 = vpack.c.bf16 %v5635_v50, %v5628_v49 }
 0x452   : > { %9046 = vmatmul.mubr.f32.vlgmr.msra.gmra.mrb[8].mxu1 %v9978_v17 }
 0x453   : > { %9049 = vmatpush3.msra.mxu1 %v5138_v14  ;;  %9050 = vmatprep.mubr.f32.mxu1 %v9943_v4 }
 0x454   : > { %9053 = vmatprep.subr.mxu1 %v5135_v12 }
 0x45a   : > { %9051 = vmatmul.mubr.f32.vlgmr.msra.gmra.mrb[8].mxu1 %v9945_v5 }
 0x45b   : > { %9054 = vmatpush3.msra.mxu1 %v5135_v12  ;;  %9055 = vmatprep.mubr.f32.mxu1 %v9951_v6 }
 0x45c   : > { %9058 = vmatprep.subr.mxu1 %v5048_v1 }
 0x462   : > { %9056 = vmatmul.mubr.f32.vlgmr.msra.gmra.mrb[8].mxu1 %v9954_v7 }
 0x463   : > { %9059 = vmatpush3.msra.mxu1 %v5048_v1  ;;  %9060 = vmatprep.mubr.f32.mxu1 %v9963_v8 }
 0x464   : > { %9063 = vmatprep.subr.mxu1 %v5136_v13 }
 0x46a   : > { %9061 = vmatmul.mubr.f32.vlgmr.msra.gmra.mrb[8].mxu1 %v9966_v9 }
 0x46b   : > { %9064 = vmatpush3.msra.mxu1 %v5136_v13  ;;  %9065 = vmatprep.mubr.f32.mxu1 %v9943_v4  ;;  %v8082_v13 = vadd.f32 0.0001, %v8080_v61 }
 0x46c   : > { %9068 = vmatprep.subr.mxu1 %v5048_v1 }
 0x472   : > { %9066 = vmatmul.mubr.f32.vlgmr.msra.gmra.mrb[8].mxu1 %v9945_v5 }
 0x473   : > { %9069 = vmatpush3.msra.mxu1 %v5048_v1  ;;  %9070 = vmatprep.mubr.f32.mxu1 %v9943_v4  ;;  %v8083_v1 = vadd.f32 0.0001, %v8081_v57 }
 0x474   : > { %9440 = vmatprep.subr.bf16.mxu1 %v9439_v46 }
 0x47a   : > { %9071 = vmatmul.mubr.f32.vlgmr.msra.gmra.mrb[8].mxu1 %v9945_v5 }
 0x47b   : > { %9442 = vmatpush3.bf16.msra.mxu1 %v9439_v46  ;;  %9077 = vmatprep.mubr.f32.mxu1 %v10028_v44 }
 0x47c   : > { %9444 = vmatprep.subr.bf16.mxu1 %v9443_v51 }
 0x482   : > { %9078 = vmatmul.mubr.f32.vlgmr.msra.gmra.mrb[8].mxu1 %v10034_v47 }
 0x483   : > { %9446 = vmatpush3.bf16.msra.mxu1 %v9443_v51  ;;  %9084 = vmatprep.mubr.f32.mxu1 %v10000_v26  ;;  %v6561_v51 = vmul.f32 %v10103_v45, %v10103_v45 }
 0x484   : > { %9448 = vmatprep.subr.bf16.mxu1 %v9447_v55 }
 0x48a   : > { %9085 = vmatmul.mubr.f32.vlgmr.msra.gmra.mrb[8].mxu1 %v10013_v34 }
 0x48b   : > { %9450 = vmatpush3.bf16.msra.mxu1 %v9447_v55  ;;  %9091 = vmatprep.mubr.f32.mxu1 %v10010_v30  ;;  %v6563_v55 = vand.u32 4294901760, %v6561_v51 }
 0x48c   : > { %9452 = vmatprep.subr.bf16.mxu1 %v9439_v46 }
 0x492   : > { %9092 = vmatmul.mubr.f32.vlgmr.msra.gmra.mrb[8].mxu1 %v10020_v39 }
 0x493   : > { %9454 = vmatpush3.bf16.msra.mxu1 %v9439_v46  ;;  %9098 = vmatprep.mubr.f32.mxu1 %v10016_v35 }
 0x494   : > { %9456 = vmatprep.subr.bf16.mxu1 %v9455_v19 }
 0x49a   : > { %9099 = vmatmul.mubr.f32.vlgmr.msra.gmra.mrb[8].mxu1 %v10026_v43 }
 0x49b   : > { %9458 = vmatpush3.bf16.msra.mxu1 %v9455_v19  ;;  %9105 = vmatprep.mubr.f32.mxu1 %v10000_v26  ;;  %v6650_v19 = vsub.f32 %v6561_v51, %v6563_v55 }
 0x49c   : > { %9460 = vmatprep.subr.bf16.mxu1 %v9439_v46 }
 0x4a2   : > { %9106 = vmatmul.mubr.f32.vlgmr.msra.gmra.mrb[8].mxu1 %v10013_v34 }
 0x4a3   : > { %9462 = vmatpush3.bf16.msra.mxu1 %v9439_v46  ;;  %9112 = vmatprep.mubr.f32.mxu1 %v10000_v26 }
 0x4a4   : > { %9512 = vmatprep.subr.bf16.mxu1 %v10053_v54 }
 0x4aa   : > { %9113 = vmatmul.mubr.f32.vlgmr.msra.gmra.mrb[8].mxu1 %v10013_v34 }
 0x4ab   : > { %9514 = vmatpush3.bf16.msra.mxu1 %v10053_v54 }
 0x4ac   : > { %9245 = vmatprep.subr.mxu1 %v10059_v59 }
 0x4af   : > { %9246 = vmatpush3.msra.mxu1 %v10059_v59 }
 0x4b0   : > { %9516 = vmatprep.subr.bf16.mxu1 %v10068_v2 }
 0x521   : > { %v9042_v56 = vpop.f32.mrb[6].mxu1 }
 0x522   : > { %v8085_v58 = vsub.f32 %v9042_v56, %v10222_v32  ;;  %v5034_v60 = vpop.f32.mrb[7].mxu1  ;;  %v6651_v56 = vand.u32 4294901760, %v6650_v19 }
 0x523   : > { %v8084_v62 = vsub.f32 %v5034_v60, %v10231_v38  ;;  %v6560_v60 = vmul.f32 %v10127_v53, %v10127_v53 }
 0x524   : > { %v8087_v63 = vmul.f32 2.0, %v8085_v58  ;;  %v6652_v45 = vsub.f32 %v6650_v19, %v6651_v56  ;;  %v6559_v58 = vmul.f32 %v10125_v52, %v10125_v52 }
 0x525   : > { %v8086_v0 = vmul.f32 2.0, %v8084_v62 }
 0x526   : > { %v8089_v12 = vadd.f32 0.0009, %v8087_v63  ;;  %v6653_v57 = vand.u32 4294901760, %v6652_v45 }
 0x527   : > { %v8088_v10 = vadd.f32 0.0009, %v8086_v0 }
 0x528   : > { %v10303_v14 = vmul.f32 %v8089_v12, %v8083_v1 }
 0x529   : > { %v10305_v15 = vmul.f32 %v8088_v10, %v8082_v13 }
 0x57d   : > { %v9114_v23 = vpop.f32.mrb[8].mxu1 }
 0x57e   : > { %v6042_v24 = vsel %vm1491_vm3, %v9114_v23, 0  ;;  %v6028_v25 = vpop.f32.mrb[9].mxu1 }
 0x57f   : > { %v6122_v32 = vand.u32 4294901760, %v6042_v24  ;;  %v6039_v27 = vsel %vm1491_vm3, %v6028_v25, 0 }
 0x580   : > { %v6112_v28 = vand.u32 4294901760, %v6039_v27 }
 0x581   : > { %v6123_v20 = vsub.f32 %v6042_v24, %v6122_v32 }
 0x582   : > { %v6113_v38 = vsub.f32 %v6039_v27, %v6112_v28 }
 0x583   : > { %v6124_v36 = vand.u32 4294901760, %v6123_v20 }
 0x584   : > { %v6114_v46 = vand.u32 4294901760, %v6113_v38 }
 0x585   : > { %v6125_v21 = vsub.f32 %v6123_v20, %v6124_v36 }
 0x586   : > { %v6115_v48 = vsub.f32 %v6113_v38, %v6114_v46 }
 0x587   : > { %v6126_v50 = vand.u32 4294901760, %v6125_v21 }
 0x588   : > { %v6116_v49 = vand.u32 4294901760, %v6115_v48 }
 0x58a   : > { %9121 = vmatprep.mubr.f32.mxu0 %v6116_v49 }
 0x58b   : > { %9122 = vmatmul.mubr.f32.vlgmr.msra.gmra.mrb[6].mxu0 %v6126_v50 }
 0x58c   : > { %9470 = vmatpush3.bf16.msra.mxu0 %v10068_v2  ;;  %9130 = vmatprep.mubr.f32.mxu0 %v6112_v28 }
 0x58d   : > { %9128 = vmatprep.subr.mxu0 %v10086_v42 }
 0x590   : > { %9129 = vmatpush3.msra.mxu0 %v10086_v42 }
 0x591   : > { %9472 = vmatprep.subr.bf16.mxu0 %v10072_v3 }
 0x593   : > { %9131 = vmatmul.mubr.f32.vlgmr.msra.gmra.mrb[6].mxu0 %v6122_v32 }
 0x594   : > { %9474 = vmatpush3.bf16.msra.mxu0 %v10072_v3  ;;  %9139 = vmatprep.mubr.f32.mxu0 %v6113_v38 }
 0x595   : > { %9137 = vmatprep.subr.mxu0 %v10077_v22 }
 0x598   : > { %9138 = vmatpush3.msra.mxu0 %v10077_v22 }
 0x599   : > { %9476 = vmatprep.subr.bf16.mxu0 %v10053_v54 }
 0x59b   : > { %9140 = vmatmul.mubr.f32.vlgmr.msra.gmra.mrb[6].mxu0 %v6123_v20  ;;  %v8094_v20 = vadd.f32 0.0001, %v10241_v18 }
 0x59c   : > { %9478 = vmatpush3.bf16.msra.mxu0 %v10053_v54  ;;  %9148 = vmatprep.mubr.f32.mxu0 %v6114_v46 }
 0x59d   : > { %9146 = vmatprep.subr.mxu0 %v10059_v59 }
 0x5a0   : > { %9147 = vmatpush3.msra.mxu0 %v10059_v59 }
 0x5a1   : > { %9480 = vmatprep.subr.bf16.mxu0 %v10074_v11 }
 0x5a3   : > { %9149 = vmatmul.mubr.f32.vlgmr.msra.gmra.mrb[6].mxu0 %v6124_v36 }
 0x5a4   : > { %9482 = vmatpush3.bf16.msra.mxu0 %v10074_v11  ;;  %9157 = vmatprep.mubr.f32.mxu0 %v6112_v28 }
 0x5a5   : > { %9155 = vmatprep.subr.mxu0 %v10082_v29 }
 0x5a8   : > { %9156 = vmatpush3.msra.mxu0 %v10082_v29 }
 0x5a9   : > { %9484 = vmatprep.subr.bf16.mxu0 %v10053_v54 }
 0x5ab   : > { %9158 = vmatmul.mubr.f32.vlgmr.msra.gmra.mrb[6].mxu0 %v6122_v32 }
 0x5ac   : > { %9486 = vmatpush3.bf16.msra.mxu0 %v10053_v54  ;;  %9166 = vmatprep.mubr.f32.mxu0 %v6112_v28 }
 0x5ad   : > { %9164 = vmatprep.subr.mxu0 %v10059_v59 }
 0x5b0   : > { %9165 = vmatpush3.msra.mxu0 %v10059_v59 }
 0x5b1   : > { %9169 = vmatprep.subr.mxu0 %v6563_v55 }
 0x5b3   : > { %9167 = vmatmul.mubr.f32.vlgmr.msra.gmra.mrb[6].mxu0 %v6122_v32 }
 0x5b4   : > { %9170 = vmatpush3.msra.mxu0 %v6563_v55  ;;  %9171 = vmatprep.mubr.f32.mxu0 %v9976_v16  ;;  %v7052_v16 = vand.u32 4294901760, %v6559_v58 }
 0x5b5   : > { %9174 = vmatprep.subr.mxu0 %v6653_v57 }
 0x5b6   : > { %v7140_v61 = vsub.f32 %v6559_v58, %v7052_v16 }
 0x5b7   : > { %9172 = vmatmul.mubr.f32.vlgmr.msra.gmra.mrb[8].mxu0 %v9978_v17  ;;  %v7055_v17 = vand.u32 4294901760, %v6560_v60 }
 0x5b8   : > { %9175 = vmatpush3.msra.mxu0 %v6653_v57  ;;  %9176 = vmatprep.mubr.f32.mxu0 %v9943_v4 }
 0x5b9   : > { %9179 = vmatprep.subr.mxu0 %v6650_v19  ;;  %v7147_v62 = vsub.f32 %v6560_v60, %v7055_v17  ;;  %v9487_v63 = vpack.c.bf16 %v7055_v17, %v7052_v16 }
 0x5bb   : > { %v7148_v52 = vand.u32 4294901760, %v7147_v62 }
 0x5bd   : > { %v7149_v0 = vsub.f32 %v7147_v62, %v7148_v52 }
 0x5bf   : > { %9177 = vmatmul.mubr.f32.vlgmr.msra.gmra.mrb[8].mxu0 %v9945_v5 }
 0x5c0   : > { %9180 = vmatpush3.msra.mxu0 %v6650_v19  ;;  %9181 = vmatprep.mubr.f32.mxu0 %v9951_v6  ;;  %v7141_v6 = vand.u32 4294901760, %v7140_v61 }
 0x5c1   : > { %9184 = vmatprep.subr.mxu0 %v6563_v55 }
 0x5c2   : > { %v7142_v53 = vsub.f32 %v7140_v61, %v7141_v6 }
 0x5c7   : > { %9182 = vmatmul.mubr.f32.vlgmr.msra.gmra.mrb[8].mxu0 %v9954_v7  ;;  %v7143_v7 = vand.u32 4294901760, %v7142_v53 }
 0x5c8   : > { %9185 = vmatpush3.msra.mxu0 %v6563_v55  ;;  %9186 = vmatprep.mubr.f32.mxu0 %v9963_v8  ;;  %v7150_v8 = vand.u32 4294901760, %v7149_v0 }
 0x5c9   : > { %9189 = vmatprep.subr.mxu0 %v6651_v56 }
 0x5ca   : > { %v9491_v1 = vpack.c.bf16 %v7150_v8, %v7143_v7 }
 0x5cf   : > { %9187 = vmatmul.mubr.f32.vlgmr.msra.gmra.mrb[8].mxu0 %v9966_v9  ;;  %v9495_v9 = vpack.c.bf16 %v7147_v62, %v7140_v61 }
 0x5d0   : > { %9190 = vmatpush3.msra.mxu0 %v6651_v56  ;;  %9191 = vmatprep.mubr.f32.mxu0 %v9943_v4 }
 0x5d1   : > { %9194 = vmatprep.subr.mxu0 %v6563_v55 }
 0x5d7   : > { %9192 = vmatmul.mubr.f32.vlgmr.msra.gmra.mrb[8].mxu0 %v9945_v5 }
 0x5d8   : > { %9195 = vmatpush3.msra.mxu0 %v6563_v55  ;;  %9196 = vmatprep.mubr.f32.mxu0 %v9943_v4  ;;  %v9503_v4 = vpack.c.bf16 %v7148_v52, %v7141_v6 }
 0x5d9   : > { %9488 = vmatprep.subr.bf16.mxu0 %v9487_v63 }
 0x5df   : > { %9197 = vmatmul.mubr.f32.vlgmr.msra.gmra.mrb[8].mxu0 %v9945_v5 }
 0x5e0   : > { %9490 = vmatpush3.bf16.msra.mxu0 %v9487_v63  ;;  %9203 = vmatprep.mubr.f32.mxu0 %v10028_v44 }
 0x5e1   : > { %9492 = vmatprep.subr.bf16.mxu0 %v9491_v1 }
 0x5e7   : > { %9204 = vmatmul.mubr.f32.vlgmr.msra.gmra.mrb[8].mxu0 %v10034_v47 }
 0x5e8   : > { %9494 = vmatpush3.bf16.msra.mxu0 %v9491_v1  ;;  %9210 = vmatprep.mubr.f32.mxu0 %v10000_v26 }
 0x5e9   : > { %9496 = vmatprep.subr.bf16.mxu0 %v9495_v9 }
 0x5ef   : > { %9211 = vmatmul.mubr.f32.vlgmr.msra.gmra.mrb[8].mxu0 %v10013_v34 }
 0x5f0   : > { %9498 = vmatpush3.bf16.msra.mxu0 %v9495_v9  ;;  %9217 = vmatprep.mubr.f32.mxu0 %v10010_v30 }
 0x5f1   : > { %9500 = vmatprep.subr.bf16.mxu0 %v9487_v63 }
 0x5f7   : > { %9218 = vmatmul.mubr.f32.vlgmr.msra.gmra.mrb[8].mxu0 %v10020_v39 }
 0x5f8   : > { %9502 = vmatpush3.bf16.msra.mxu0 %v9487_v63  ;;  %9224 = vmatprep.mubr.f32.mxu0 %v10016_v35 }
 0x5f9   : > { %9504 = vmatprep.subr.bf16.mxu0 %v9503_v4 }
 0x5ff   : > { %9225 = vmatmul.mubr.f32.vlgmr.msra.gmra.mrb[8].mxu0 %v10026_v43 }
 0x600   : > { %9506 = vmatpush3.bf16.msra.mxu0 %v9503_v4  ;;  %9231 = vmatprep.mubr.f32.mxu0 %v10000_v26 }
 0x601   : > { %9508 = vmatprep.subr.bf16.mxu0 %v9487_v63 }
 0x607   : > { %9232 = vmatmul.mubr.f32.vlgmr.msra.gmra.mrb[8].mxu0 %v10013_v34 }
 0x608   : > { %9510 = vmatpush3.bf16.msra.mxu0 %v9487_v63  ;;  %9238 = vmatprep.mubr.f32.mxu0 %v10000_v26 }
 0x60f   : > { %9239 = vmatmul.mubr.f32.vlgmr.msra.gmra.mrb[8].mxu0 %v10013_v34 }
 0x686   : > { %v9168_v5 = vpop.f32.mrb[6].mxu0 }
 0x687   : > { %v8097_v30 = vsub.f32 %v9168_v5, %v10219_v31  ;;  %v6549_v39 = vpop.f32.mrb[7].mxu0 }
 0x688   : > { %v8096_v35 = vsub.f32 %v6549_v39, %v10228_v37 }
 0x6e2   : > { %v9240_v44 = vpop.f32.mrb[8].mxu0 }
 0x6e3   : > { %v7557_v43 = vsel %vm1491_vm3, %v9240_v44, 0  ;;  %v7543_v47 = vpop.f32.mrb[9].mxu0 }
 0x6e4   : > { %v7637_v12 = vand.u32 4294901760, %v7557_v43  ;;  %v7554_v13 = vsel %vm1491_vm3, %v7543_v47, 0 }
 0x6e5   : > { %v7627_v10 = vand.u32 4294901760, %v7554_v13 }
 0x6e6   : > { %v7638_v23 = vsub.f32 %v7557_v43, %v7637_v12 }
 0x6e7   : > { %v7628_v24 = vsub.f32 %v7554_v13, %v7627_v10 }
 0x6e8   : > { %v7639_v25 = vand.u32 4294901760, %v7638_v23 }
 0x6e9   : > { %v7629_v26 = vand.u32 4294901760, %v7628_v24 }
 0x6ea   : > { %v7640_v32 = vsub.f32 %v7638_v23, %v7639_v25 }
 0x6eb   : > { %v7630_v34 = vsub.f32 %v7628_v24, %v7629_v26 }
 0x6ec   : > { %v7641_v28 = vand.u32 4294901760, %v7640_v32 }
 0x6ed   : > { %v7631_v27 = vand.u32 4294901760, %v7630_v34 }
 0x6ef   : > { %9247 = vmatprep.mubr.f32.mxu1 %v7631_v27 }
 0x6f0   : > { %9248 = vmatmul.mubr.f32.vlgmr.msra.gmra.mrb[10].mxu1 %v7641_v28 }
 0x6f1   : > { %9518 = vmatpush3.bf16.msra.mxu1 %v10068_v2  ;;  %9256 = vmatprep.mubr.f32.mxu1 %v7627_v10 }
 0x6f2   : > { %9254 = vmatprep.subr.mxu1 %v10086_v42 }
 0x6f5   : > { %9255 = vmatpush3.msra.mxu1 %v10086_v42 }
 0x6f6   : > { %9520 = vmatprep.subr.bf16.mxu1 %v10072_v3 }
 0x6f8   : > { %9257 = vmatmul.mubr.f32.vlgmr.msra.gmra.mrb[10].mxu1 %v7637_v12 }
 0x6f9   : > { %9522 = vmatpush3.bf16.msra.mxu1 %v10072_v3  ;;  %9265 = vmatprep.mubr.f32.mxu1 %v7628_v24 }
 0x6fa   : > { %9263 = vmatprep.subr.mxu1 %v10077_v22 }
 0x6fd   : > { %9264 = vmatpush3.msra.mxu1 %v10077_v22 }
 0x6fe   : > { %9524 = vmatprep.subr.bf16.mxu1 %v10053_v54 }
 0x700   : > { %9266 = vmatmul.mubr.f32.vlgmr.msra.gmra.mrb[10].mxu1 %v7638_v23 }
 0x701   : > { %9526 = vmatpush3.bf16.msra.mxu1 %v10053_v54  ;;  %9274 = vmatprep.mubr.f32.mxu1 %v7629_v26 }
 0x702   : > { %9272 = vmatprep.subr.mxu1 %v10059_v59 }
 0x705   : > { %9273 = vmatpush3.msra.mxu1 %v10059_v59 }
 0x706   : > { %9528 = vmatprep.subr.bf16.mxu1 %v10074_v11 }
 0x708   : > { %9275 = vmatmul.mubr.f32.vlgmr.msra.gmra.mrb[10].mxu1 %v7639_v25 }
 0x709   : > { %9530 = vmatpush3.bf16.msra.mxu1 %v10074_v11  ;;  %9283 = vmatprep.mubr.f32.mxu1 %v7627_v10 }
 0x70a   : > { %9281 = vmatprep.subr.mxu1 %v10082_v29 }
 0x70d   : > { %9282 = vmatpush3.msra.mxu1 %v10082_v29  ;;  %v8095_v29 = vadd.f32 0.0001, %v10237_v41 }
 0x70e   : > { %9532 = vmatprep.subr.bf16.mxu1 %v10053_v54 }
 0x710   : > { %9284 = vmatmul.mubr.f32.vlgmr.msra.gmra.mrb[10].mxu1 %v7637_v12 }
 0x711   : > { %9534 = vmatpush3.bf16.msra.mxu1 %v10053_v54  ;;  %9292 = vmatprep.mubr.f32.mxu1 %v7627_v10 }
 0x712   : > { %9290 = vmatprep.subr.mxu1 %v10059_v59 }
 0x715   : > { %9291 = vmatpush3.msra.mxu1 %v10059_v59 }
 0x718   : > { %9293 = vmatmul.mubr.f32.vlgmr.msra.gmra.mrb[10].mxu1 %v7637_v12 }
 0x7eb   : > { %v9294_v2 = vpop.f32.mrb[10].mxu1 }
 0x7ec   : > { %v8099_v3 = vsub.f32 %v9294_v2, %v10224_v33  ;;  %v8064_v11 = vpop.f32.mrb[11].mxu1 }
 0x7ed   : > { %v8098_v22 = vsub.f32 %v8064_v11, %v10233_v40 }
 0x7ee   : > { %v8101_v42 = vadd.f32 %v8099_v3, %v8097_v30 }
 0x7ef   : > { %v8100_v31 = vadd.f32 %v8098_v22, %v8096_v35 }
 0x7f0   : > { %v8103_v37 = vadd.f32 0.0009, %v8101_v42 }
 0x7f1   : > { %v8102_v54 = vadd.f32 0.0009, %v8100_v31 }
 0x7f2   : > { %v8105_v38 = vmul.f32 %v8103_v37, %v8095_v29 }
 0x7f3   : > { %v8104_v36 = vmul.f32 %v8102_v54, %v8094_v20 }
 0x7f4   : > { %v8107_v46 = vmax.f32 %v8105_v38, 1e-12 }
 0x7f5   : > { %v8106_v21 = vmax.f32 %v8104_v36, 1e-12 }
 0x7f6   : > { %9755 = vrcp.f32 %v8107_v46 }
 0x7f7   : > { %9757 = vrcp.f32 %v8106_v21 }
 0x800   : > { %v9756_v59 = vpop.eup %9755 }
 0x801   : > { %v9758_v48 = vpop.eup %9757  ;;  %v8111_v33 = vmul.f32 %v9756_v59, %v8107_v46 }
 0x802   : > { %v8110_v49 = vmul.f32 %v9758_v48, %v8106_v21 }
 0x803   : > { %v8113_v50 = vsub.f32 2.0, %v8111_v33 }
 0x804   : > { %v8112_v40 = vsub.f32 2.0, %v8110_v49 }
 0x805   : > { %v8115_v51 = vmul.f32 %v9756_v59, %v8113_v50 }
 0x806   : > { %v8114_v55 = vmul.f32 %v9758_v48, %v8112_v40 }
 0x807   : > { %v8117_v41 = vmul.f32 %v8115_v51, %v10303_v14 }
 0x808   : > { %v8116_v19 = vmul.f32 %v8114_v55, %v10305_v15 }
 0x809   : > { %v8119_v18 = vsub.f32 1.0, %v8117_v41 }
 0x80a   : > { %v8118_v56 = vsub.f32 1.0, %v8116_v19 }
 0x80b   : > { %v8121_v45 = vmul.f32 0.5, %v8119_v18 }
 0x80c   : > { %v8120_v57 = vmul.f32 0.5, %v8118_v56 }
 0x80d   : > { %v8123_v58 = vmax.f32 %v8121_v45, 0.0 }
 0x80e   : > { %v8122_v60 = vmax.f32 %v8120_v57, 0.0 }
 0x80f   : > { %v8125_v16 = vmin.f32 %v8123_v58, 1.0 }
 0x810   : > { %v8124_v17 = vmin.f32 %v8122_v60, 1.0 }
 0x811   : > { %v8127_v61 = vsub.f32 1.0, %v8125_v16 }
 0x812   : > { %v8126_v62 = vsub.f32 1.0, %v8124_v17 }
 0x813   : > { %v8129_v6 = vmul.f32 0.5, %v8127_v61 }
 0x814   : > { %v8128_v52 = vmul.f32 0.5, %v8126_v62 }
 0x815   : > { %v8131_v63 = vsel %vm982_vm1, %v8129_v6, 0.0 }
 0x816   : > { %v8130_v14 = vsel %vm982_vm1, %v8128_v52, 0.0 }
 0x817   : > { %v8132_v53 = vadd.f32 %v8131_v63, %v8130_v14 }
 0x819   : > { %8133 = vadd.xlane.f32.xlu0 %v8132_v53 }
 0x8a6   : > { %v8134_v15 = vpop.xlane.xlu0 %8133 }
 0x8a7   : > { %v8135_v0 = vrot.slane %v8134_v15, 4 }
 0x8a9   : > { %v8136_v7 = vadd.f32 %v8135_v0, %v8134_v15 }
 0x8ab   : > { %v8137_v8 = vrot.slane %v8136_v7, 2 }
 0x8ad   : > { %v8138_v1 = vadd.f32 %v8137_v8, %v8136_v7 }
 0x8af   : > { %v8139_v9 = vrot.slane %v8138_v1, 1 }
 0x8b1   : > { %v8140_v4 = vadd.f32 %v8139_v9, %v8138_v1 }
 0x8b3   : > { %9697 = vpush %v8140_v4 }
 0x8e4   : > { %s9698_s8 = spop %9697 }
 0x8e5   : > { %v8142_v5 = vstv %s9698_s8 }
 0x8e6   : > { %8143 = vst [vmem:[%s412_s22] sm:$0xff] %v8142_v5 }
 0x8e7   : > { %9772 = shalt.err (!%p9769_p5)
}
 0x8e8   : > { %s9773_s20 = scalar_lea.hbm %s10396_s15, 128  ;;  %s9777_s30 = scalar_lea.hbm %s10448_s7, 1024 }
 0x8e9   : > { %p9774_p6 = scmp.ne.s32.totalorder %s10396_s15, %s9773_s20  ;;  %p9778_p10 = scmp.lt.u32.totalorder %s10396_s15, %s10448_s7 }
 0x8ea   : > { %p9779_p11 = scmp.lt.u32.totalorder %s9777_s30, %s9773_s20  ;;  %p9781_p13 = scmp.lt.u32.totalorder %s9773_s20, %s10396_s15 }
 0x8eb   : > { %p9775_p7 = pnand %p9774_p6, %p9920_p4 }
 0x8ec   : > { %p9780_p12 = por %p9779_p11, %p9778_p10 }
 0x8ed   : > { %p9776_p9 = pneg %p9775_p7 }
 0x8ee   : > { %p9782_p0 = por %p9781_p13, %p9780_p12 }
 0x8f0   : > { %p9783_p1 = pnand %p9782_p0, %p9776_p9 }
 0x8f2   : > { %9786 = shalt.err (!%p9783_p1)
}
 0x8f3   : > { %9699 = dma.vmem_to_hbm [thread:$0]  (%p9920_p4), %s10391_s23, 128, %s10396_s15, %s8145_s16  }
 0x8f4 PF: > { %p9706_p2 = scmp.ge.s32.totalorder %s9837_s29, 2  ;;  %s8171_s12 = sand.u32 1, %s9817_s24  }
 0x8f5   : > { %s8172_s21 = scalar_lea.sflag [#allocation3], %s8171_s12 }
 0x8f6   : > { %p9702_p3 = pnand %p9706_p2, %p9927_p8 }
 0x8f8   : > { %9812 = dma.done.wait (!%p9702_p3), %s8172_s21, 128  }
 0x8f9   : > { %9814 = vsyncadd (!%p9702_p3), %s8172_s21, 4294967168  ;;  %s20_s29 = sadd.s32 1, %s9837_s29   ;;  %s10451_s24 = smov %s9821_s25 }
 0x8fa   : > { %p17_p5 = scmp.ge.s32.totalorder %s20_s29, 10   ;;  %s10452_s25 = smov %s9825_s26 }
 0x8fb   : > { %s10453_s26 = smov %s9933_s14  ;;  %s10454_s27 = smov %s9833_s28 }
 0x8fc   : > { %s10455_s28 = smov %s10457_s9  ;;  %19 = sbr.rel (!%p17_p5) target bundleno = 4 (0x4), region = 92 }
 0x903   :  { %8177 = vsyncpa [#allocation3], 1 }
 0x904   :  { %8179 = vsyncpa [#allocation3 + $0x1], 1 }

</bundles_post_ra>
